<compile_context>
chip_gen: v6e
topology: v6e:2x2x1
jax: 0.10.0
libtpu: 0.0.40
codegen_flags: <defaults>
</compile_context>

<pallas_src>
import functools
import math

import jax
import jax.numpy as jnp
from jax import lax
from jax.experimental import pallas as pl
from jax.experimental.pallas import tpu as pltpu


# ----------------------------------------------------------------------------- in-kernel helpers

def _gelu(x):
    # tanh approximation of GELU
    # TODO(synk): HF BertModel default is the exact erf-form GELU; tanh approx deviates ~1e-3.
    return 0.5 * x * (1.0 + jnp.tanh(0.7978845608028654 * (x + 0.044715 * x * x * x)))


def _ln(x, g, b, eps):
    mu = jnp.mean(x, axis=-1, keepdims=True)
    d = x - mu
    var = jnp.mean(d * d, axis=-1, keepdims=True)
    return d * lax.rsqrt(var + eps) * g + b


# ----------------------------------------------------------------------------- kernels

def _layernorm_kernel(x_ref, g_ref, b_ref, o_ref, *, eps):
    o_ref[...] = _ln(x_ref[...], g_ref[...], b_ref[...], eps).astype(o_ref.dtype)


def layernorm(x, gamma, beta, eps=1e-12):
    """x: (M, H); gamma, beta: (1, H) -> LayerNorm(x). Single whole-array pallas_call."""
    return pl.pallas_call(
        functools.partial(_layernorm_kernel, eps=eps),
        out_shape=jax.ShapeDtypeStruct(x.shape, jnp.float32),
    )(x, gamma, beta)


def _fused_layer_kernel(*refs, B, S, H, nH, Dh, eps, scale, with_head):
    """One full transformer encoder layer (optionally + pooler + classifier) in VMEM."""
    (h_ref, bias_ref, wqkv_ref, bqkv_ref, wo_ref, bo_ref,
     ln1_g_ref, ln1_b_ref, wi_ref, bi_ref, wo2_ref, bo2_ref,
     ln2_g_ref, ln2_b_ref) = refs[:14]
    if with_head:
        pw_ref, pb_ref, fcw_ref, fcb_ref = refs[14:18]
    out_ref = refs[-2]
    ctx_ref = refs[-1]                                           # VMEM scratch (B*S, H)

    h = h_ref[...]                                               # (B*S, H) f32

    # ---- fused Q|K|V projection: ONE MXU pass over the concatenated (H, 3H) weight ----
    qkv = jnp.dot(h, wqkv_ref[...], preferred_element_type=jnp.float32) + bqkv_ref[...]

    # ---- multi-head self-attention, fully VMEM-resident (static per-(batch, head) tiles) ----
    bias = bias_ref[...]                                         # (B, S) additive mask bias
    for b in range(B):
        bias_b = bias[b:b + 1, :]                                # (1, S), broadcast over queries
        for hd in range(nH):
            rs, re = b * S, (b + 1) * S
            q = qkv[rs:re, hd * Dh:(hd + 1) * Dh]                # (S, Dh)
            k = qkv[rs:re, H + hd * Dh:H + (hd + 1) * Dh]        # (S, Dh)
            v = qkv[rs:re, 2 * H + hd * Dh:2 * H + (hd + 1) * Dh]
            # q @ k^T without an explicit transpose
            s = lax.dot_general(q, k, (((1,), (1,)), ((), ())),
                                preferred_element_type=jnp.float32) * scale + bias_b
            s = s - jnp.max(s, axis=-1, keepdims=True)
            p = jnp.exp(s)
            # softmax denominator on the EUP slot (approx reciprocal) instead of a VPU divide
            p = p * pl.reciprocal(jnp.sum(p, axis=-1, keepdims=True), approx=True)
            ctx_ref[pl.ds(b * S, S), pl.ds(hd * Dh, Dh)] = jnp.dot(
                p, v, preferred_element_type=jnp.float32)

    ctx = ctx_ref[...]                                           # (B*S, H)

    # ---- attention output projection + residual LayerNorm ----
    attn_out = jnp.dot(ctx, wo_ref[...], preferred_element_type=jnp.float32) + bo_ref[...]
    h1 = _ln(attn_out + h, ln1_g_ref[...], ln1_b_ref[...], eps)

    # ---- feed-forward (GELU) + residual LayerNorm ----
    inter = _gelu(jnp.dot(h1, wi_ref[...], preferred_element_type=jnp.float32) + bi_ref[...])
    ffn = jnp.dot(inter, wo2_ref[...], preferred_element_type=jnp.float32) + bo2_ref[...]
    h2 = _ln(ffn + h1, ln2_g_ref[...], ln2_b_ref[...], eps)

    if with_head:
        # Pooler (tanh) + classifier fused into the last layer's kernel, applied row-wise.
        # The wrapper selects the [CLS] row of each batch element afterwards; extra rows are
        # negligible (everything is well under a single vreg of work).
        pooled = jnp.tanh(jnp.dot(h2, pw_ref[...], preferred_element_type=jnp.float32)
                          + pb_ref[...])
        logits = jnp.dot(pooled, fcw_ref[...], preferred_element_type=jnp.float32) + fcb_ref[...]
        out_ref[...] = logits.astype(out_ref.dtype)
    else:
        out_ref[...] = h2.astype(out_ref.dtype)


def fused_layer(h, bias, lp, *, B, S, nH, Dh, eps, head=None):
    """One transformer encoder layer as a single pallas_call (optionally fusing pooler+fc)."""
    BS, H = h.shape
    with_head = head is not None
    inputs = [h, bias, lp["wqkv"], lp["bqkv"], lp["wo"], lp["bo"],
              lp["ln1_g"], lp["ln1_b"], lp["wi"], lp["bi"],
              lp["wo2"], lp["bo2"], lp["ln2_g"], lp["ln2_b"]]
    if with_head:
        inputs += [head["pooler_w"], head["pooler_b"], head["fc_w"], head["fc_b"]]
        out_shape = jax.ShapeDtypeStruct((BS, head["fc_w"].shape[1]), jnp.float32)
    else:
        out_shape = jax.ShapeDtypeStruct((BS, H), jnp.float32)
    kernel = functools.partial(
        _fused_layer_kernel, B=B, S=S, H=H, nH=nH, Dh=Dh,
        eps=eps, scale=1.0 / math.sqrt(Dh), with_head=with_head)
    return pl.pallas_call(
        kernel,
        out_shape=out_shape,
        scratch_shapes=[pltpu.VMEM((BS, H), jnp.float32)],       # attention context buffer
    )(*inputs)


# ----------------------------------------------------------------------------- params

class Config:
    vocab_size = 64
    hidden_size = 32
    num_heads = 2
    num_layers = 2
    intermediate_size = 64
    max_position = 16
    type_vocab_size = 2
    num_classes = 3
    layer_norm_eps = 1e-12


def init_params(cfg, key):
    keys = iter(jax.random.split(key, 64))

    def w(shape, scale=0.02):
        return (scale * jax.random.normal(next(keys), shape)).astype(jnp.float32)

    def zeros(shape):
        return jnp.zeros(shape, jnp.float32)

    def ones(shape):
        return jnp.ones(shape, jnp.float32)

    H, I, C = cfg.hidden_size, cfg.intermediate_size, cfg.num_classes
    params = {
        "word_emb": w((cfg.vocab_size, H)),
        "pos_emb": w((cfg.max_position, H)),
        "type_emb": w((cfg.type_vocab_size, H)),
        "emb_ln_g": ones((1, H)), "emb_ln_b": zeros((1, H)),
        "layers": [],
        "pooler_w": w((H, H)), "pooler_b": zeros((1, H)),
        "fc_w": w((H, C)), "fc_b": zeros((1, C)),
    }
    for _ in range(cfg.num_layers):
        params["layers"].append({
            "wqkv": w((H, 3 * H)), "bqkv": zeros((1, 3 * H)),   # fused Q|K|V projection
            "wo": w((H, H)), "bo": zeros((1, H)),
            "ln1_g": ones((1, H)), "ln1_b": zeros((1, H)),
            "wi": w((H, I)), "bi": zeros((1, I)),
            "wo2": w((I, H)), "bo2": zeros((1, H)),
            "ln2_g": ones((1, H)), "ln2_b": zeros((1, H)),
        })
    return params


# ----------------------------------------------------------------------------- forward

def model_forward(params, context, mask, cfg):
    """context: (B, S) int32 token ids, mask: (B, S) attention mask -> (B, num_classes)."""
    B, S = context.shape
    H = cfg.hidden_size
    nH = cfg.num_heads
    Dh = H // nH

    # --- embeddings (gather is plain-JAX glue; LayerNorm is a Pallas kernel) ---
    word = jnp.take(params["word_emb"], context, axis=0)             # (B, S, H)
    pos = params["pos_emb"][:S][None, :, :]                          # (1, S, H)
    ttype = params["type_emb"][0][None, None, :]                     # token_type_ids = 0
    emb = (word + pos + ttype).reshape(B * S, H)
    h = layernorm(emb, params["emb_ln_g"], params["emb_ln_b"], cfg.layer_norm_eps)

    # --- extended attention mask: (1 - mask) * -10000 added to attention scores ---
    bias = (1.0 - mask.astype(jnp.float32)) * -10000.0               # (B, S)

    head = {"pooler_w": params["pooler_w"], "pooler_b": params["pooler_b"],
            "fc_w": params["fc_w"], "fc_b": params["fc_b"]}

    n_layers = len(params["layers"])
    logits = None
    for li, lp in enumerate(params["layers"]):
        is_last = li == n_layers - 1
        out = fused_layer(h, bias, lp, B=B, S=S, nH=nH, Dh=Dh,
                          eps=cfg.layer_norm_eps,
                          head=head if is_last else None)
        if is_last:
            # pooler + classifier were applied row-wise in-kernel; pick the [CLS] row per batch
            logits = out.reshape(B, S, -1)[:, 0, :]                  # (B, num_classes)
        else:
            h = out
    return logits


# ----------------------------------------------------------------------------- main

if __name__ == "__main__":
    cfg = Config()
    key = jax.random.PRNGKey(0)
    k_param, k_tok = jax.random.split(key, 2)

    params = init_params(cfg, k_param)

    B, S = 2, 8
    context = jax.random.randint(k_tok, (B, S), 0, cfg.vocab_size, dtype=jnp.int32)
    # simple attention mask: first sequence fully valid, second has 2 padding tokens
    mask = jnp.array([[1] * S, [1] * (S - 2) + [0] * 2], dtype=jnp.int32)

    fwd = jax.jit(functools.partial(model_forward, cfg=cfg))
    out = fwd(params, context, mask)
    jax.block_until_ready(out)

    assert out.shape == (B, cfg.num_classes)
    assert out.dtype == jnp.float32
    assert bool(jnp.all(jnp.isfinite(out)))
    print("KERNEL_OK")
</pallas_src>

<mosaic_0001>
module attributes {stable_mosaic.version = 11 : i64} {
  func.func @_layernorm_kernel(%arg0: memref<16x32xf32, #tpu.memory_space<vmem>>, %arg1: memref<1x32xf32, #tpu.memory_space<vmem>>, %arg2: memref<1x32xf32, #tpu.memory_space<vmem>>, %arg3: memref<16x32xf32, #tpu.memory_space<vmem>>) attributes {dimension_semantics = [], scalar_prefetch = 0 : i64, scratch_operands = 0 : i64, tpu.core_type = #tpu.core_type<tc>} {
    %c0 = arith.constant 0 : index
    %c0_0 = arith.constant 0 : index
    %0 = vector.load %arg0[%c0, %c0_0] : memref<16x32xf32, #tpu.memory_space<vmem>>, vector<16x32xf32>
    %c0_1 = arith.constant 0 : index
    %c0_2 = arith.constant 0 : index
    %1 = vector.load %arg1[%c0_1, %c0_2] : memref<1x32xf32, #tpu.memory_space<vmem>>, vector<1x32xf32>
    %c0_3 = arith.constant 0 : index
    %c0_4 = arith.constant 0 : index
    %2 = vector.load %arg2[%c0_3, %c0_4] : memref<1x32xf32, #tpu.memory_space<vmem>>, vector<1x32xf32>
    %cst = arith.constant dense<0.000000e+00> : vector<16xf32>
    %3 = vector.multi_reduction <add>, %0, %cst [1] : vector<16x32xf32> to vector<16xf32>
    %4 = vector.shape_cast %3 : vector<16xf32> to vector<16x1xf32>
    %cst_5 = arith.constant 3.200000e+01 : f32
    %5 = vector.broadcast %cst_5 : f32 to vector<16x1xf32>
    %6 = arith.divf %4, %5 : vector<16x1xf32>
    %7 = vector.broadcast %6 : vector<16x1xf32> to vector<16x32xf32>
    %8 = arith.subf %0, %7 : vector<16x32xf32>
    %9 = arith.mulf %8, %8 : vector<16x32xf32>
    %cst_6 = arith.constant dense<0.000000e+00> : vector<16xf32>
    %10 = vector.multi_reduction <add>, %9, %cst_6 [1] : vector<16x32xf32> to vector<16xf32>
    %11 = vector.shape_cast %10 : vector<16xf32> to vector<16x1xf32>
    %cst_7 = arith.constant 3.200000e+01 : f32
    %12 = vector.broadcast %cst_7 : f32 to vector<16x1xf32>
    %13 = arith.divf %11, %12 : vector<16x1xf32>
    %cst_8 = arith.constant 9.99999996E-13 : f32
    %14 = vector.broadcast %cst_8 : f32 to vector<16x1xf32>
    %15 = arith.addf %13, %14 : vector<16x1xf32>
    %16 = math.rsqrt %15 : vector<16x1xf32>
    %17 = vector.broadcast %16 : vector<16x1xf32> to vector<16x32xf32>
    %18 = arith.mulf %8, %17 : vector<16x32xf32>
    %19 = vector.broadcast %1 : vector<1x32xf32> to vector<16x32xf32>
    %20 = arith.mulf %18, %19 : vector<16x32xf32>
    %21 = vector.broadcast %2 : vector<1x32xf32> to vector<16x32xf32>
    %22 = arith.addf %20, %21 : vector<16x32xf32>
    %c0_9 = arith.constant 0 : index
    %c0_10 = arith.constant 0 : index
    %23 = vector.load %arg3[%c0_9, %c0_10] : memref<16x32xf32, #tpu.memory_space<vmem>>, vector<16x32xf32>
    tpu.vector_store %arg3[%c0_9, %c0_10], %22 {strides = array<i32>} : memref<16x32xf32, #tpu.memory_space<vmem>>, vector<16x32xf32>,
    return
  }
}

module attributes {stable_mosaic.version = 11 : i64} {
  func.func @_fused_layer_kernel(%arg0: memref<16x32xf32, #tpu.memory_space<vmem>>, %arg1: memref<2x8xf32, #tpu.memory_space<vmem>>, %arg2: memref<32x96xf32, #tpu.memory_space<vmem>>, %arg3: memref<1x96xf32, #tpu.memory_space<vmem>>, %arg4: memref<32x32xf32, #tpu.memory_space<vmem>>, %arg5: memref<1x32xf32, #tpu.memory_space<vmem>>, %arg6: memref<1x32xf32, #tpu.memory_space<vmem>>, %arg7: memref<1x32xf32, #tpu.memory_space<vmem>>, %arg8: memref<32x64xf32, #tpu.memory_space<vmem>>, %arg9: memref<1x64xf32, #tpu.memory_space<vmem>>, %arg10: memref<64x32xf32, #tpu.memory_space<vmem>>, %arg11: memref<1x32xf32, #tpu.memory_space<vmem>>, %arg12: memref<1x32xf32, #tpu.memory_space<vmem>>, %arg13: memref<1x32xf32, #tpu.memory_space<vmem>>, %arg14: memref<16x32xf32, #tpu.memory_space<vmem>>, %arg15: memref<16x32xf32, #tpu.memory_space<vmem>>) attributes {dimension_semantics = [], scalar_prefetch = 0 : i64, scratch_operands = 1 : i64, tpu.core_type = #tpu.core_type<tc>} {
    %c0 = arith.constant 0 : index
    %c0_0 = arith.constant 0 : index
    %0 = vector.load %arg0[%c0, %c0_0] : memref<16x32xf32, #tpu.memory_space<vmem>>, vector<16x32xf32>
    %c0_1 = arith.constant 0 : index
    %c0_2 = arith.constant 0 : index
    %1 = vector.load %arg2[%c0_1, %c0_2] : memref<32x96xf32, #tpu.memory_space<vmem>>, vector<32x96xf32>
    %cst = arith.constant dense<0.000000e+00> : vector<16x96xf32>
    %2 = tpu.matmul %0, %1, %cst {dimension_numbers = #tpu.dot_dimension_numbers<[1], [0], [0], [1], [0, 0, 1, 1], [], []>} : vector<16x32xf32>, vector<32x96xf32>, vector<16x96xf32> -> vector<16x96xf32>
    %c0_3 = arith.constant 0 : index
    %c0_4 = arith.constant 0 : index
    %3 = vector.load %arg3[%c0_3, %c0_4] : memref<1x96xf32, #tpu.memory_space<vmem>>, vector<1x96xf32>
    %4 = vector.broadcast %3 : vector<1x96xf32> to vector<16x96xf32>
    %5 = arith.addf %2, %4 : vector<16x96xf32>
    %c0_5 = arith.constant 0 : index
    %c0_6 = arith.constant 0 : index
    %6 = vector.load %arg1[%c0_5, %c0_6] : memref<2x8xf32, #tpu.memory_space<vmem>>, vector<2x8xf32>
    %7 = vector.extract_strided_slice %6 {offsets = [0, 0], sizes = [1, 8], strides = [1, 1]} : vector<2x8xf32> to vector<1x8xf32>
    %8 = vector.extract_strided_slice %5 {offsets = [0, 0], sizes = [8, 16], strides = [1, 1]} : vector<16x96xf32> to vector<8x16xf32>
    %9 = vector.extract_strided_slice %5 {offsets = [0, 32], sizes = [8, 16], strides = [1, 1]} : vector<16x96xf32> to vector<8x16xf32>
    %10 = vector.extract_strided_slice %5 {offsets = [0, 64], sizes = [8, 16], strides = [1, 1]} : vector<16x96xf32> to vector<8x16xf32>
    %cst_7 = arith.constant dense<0.000000e+00> : vector<8x8xf32>
    %11 = tpu.matmul %8, %9, %cst_7 {dimension_numbers = #tpu.dot_dimension_numbers<[1], [1], [0], [0], [0, 0, 1, 0], [], []>} : vector<8x16xf32>, vector<8x16xf32>, vector<8x8xf32> -> vector<8x8xf32>
    %cst_8 = arith.constant 2.500000e-01 : f32
    %12 = vector.broadcast %cst_8 : f32 to vector<8x8xf32>
    %13 = arith.mulf %11, %12 : vector<8x8xf32>
    %14 = vector.broadcast %7 : vector<1x8xf32> to vector<8x8xf32>
    %15 = arith.addf %13, %14 : vector<8x8xf32>
    %cst_9 = arith.constant dense<0xFF800000> : vector<8xf32>
    %16 = vector.multi_reduction <maximumf>, %15, %cst_9 [1] : vector<8x8xf32> to vector<8xf32>
    %17 = vector.shape_cast %16 : vector<8xf32> to vector<8x1xf32>
    %18 = vector.broadcast %17 : vector<8x1xf32> to vector<8x8xf32>
    %19 = arith.subf %15, %18 : vector<8x8xf32>
    %20 = math.exp %19 : vector<8x8xf32>
    %cst_10 = arith.constant dense<0.000000e+00> : vector<8xf32>
    %21 = vector.multi_reduction <add>, %20, %cst_10 [1] : vector<8x8xf32> to vector<8xf32>
    %22 = vector.shape_cast %21 : vector<8xf32> to vector<8x1xf32>
    %23 = tpu.reciprocal %22 {approx = true} : vector<8x1xf32> -> vector<8x1xf32>
    %24 = vector.broadcast %23 : vector<8x1xf32> to vector<8x8xf32>
    %25 = arith.mulf %20, %24 : vector<8x8xf32>
    %cst_11 = arith.constant dense<0.000000e+00> : vector<8x16xf32>
    %26 = tpu.matmul %25, %10, %cst_11 {dimension_numbers = #tpu.dot_dimension_numbers<[1], [0], [0], [1], [0, 0, 1, 1], [], []>} : vector<8x8xf32>, vector<8x16xf32>, vector<8x16xf32> -> vector<8x16xf32>
    %c0_12 = arith.constant 0 : index
    %c0_13 = arith.constant 0 : index
    %27 = vector.load %arg15[%c0_12, %c0_13] : memref<16x32xf32, #tpu.memory_space<vmem>>, vector<8x16xf32>
    tpu.vector_store %arg15[%c0_12, %c0_13], %26 {strides = array<i32>} : memref<16x32xf32, #tpu.memory_space<vmem>>, vector<8x16xf32>,
    %28 = vector.extract_strided_slice %5 {offsets = [0, 16], sizes = [8, 16], strides = [1, 1]} : vector<16x96xf32> to vector<8x16xf32>
    %29 = vector.extract_strided_slice %5 {offsets = [0, 48], sizes = [8, 16], strides = [1, 1]} : vector<16x96xf32> to vector<8x16xf32>
    %30 = vector.extract_strided_slice %5 {offsets = [0, 80], sizes = [8, 16], strides = [1, 1]} : vector<16x96xf32> to vector<8x16xf32>
    %cst_14 = arith.constant dense<0.000000e+00> : vector<8x8xf32>
    %31 = tpu.matmul %28, %29, %cst_14 {dimension_numbers = #tpu.dot_dimension_numbers<[1], [1], [0], [0], [0, 0, 1, 0], [], []>} : vector<8x16xf32>, vector<8x16xf32>, vector<8x8xf32> -> vector<8x8xf32>
    %cst_15 = arith.constant 2.500000e-01 : f32
    %32 = vector.broadcast %cst_15 : f32 to vector<8x8xf32>
    %33 = arith.mulf %31, %32 : vector<8x8xf32>
    %34 = vector.broadcast %7 : vector<1x8xf32> to vector<8x8xf32>
    %35 = arith.addf %33, %34 : vector<8x8xf32>
    %cst_16 = arith.constant dense<0xFF800000> : vector<8xf32>
    %36 = vector.multi_reduction <maximumf>, %35, %cst_16 [1] : vector<8x8xf32> to vector<8xf32>
    %37 = vector.shape_cast %36 : vector<8xf32> to vector<8x1xf32>
    %38 = vector.broadcast %37 : vector<8x1xf32> to vector<8x8xf32>
    %39 = arith.subf %35, %38 : vector<8x8xf32>
    %40 = math.exp %39 : vector<8x8xf32>
    %cst_17 = arith.constant dense<0.000000e+00> : vector<8xf32>
    %41 = vector.multi_reduction <add>, %40, %cst_17 [1] : vector<8x8xf32> to vector<8xf32>
    %42 = vector.shape_cast %41 : vector<8xf32> to vector<8x1xf32>
    %43 = tpu.reciprocal %42 {approx = true} : vector<8x1xf32> -> vector<8x1xf32>
    %44 = vector.broadcast %43 : vector<8x1xf32> to vector<8x8xf32>
    %45 = arith.mulf %40, %44 : vector<8x8xf32>
    %cst_18 = arith.constant dense<0.000000e+00> : vector<8x16xf32>
    %46 = tpu.matmul %45, %30, %cst_18 {dimension_numbers = #tpu.dot_dimension_numbers<[1], [0], [0], [1], [0, 0, 1, 1], [], []>} : vector<8x8xf32>, vector<8x16xf32>, vector<8x16xf32> -> vector<8x16xf32>
    %c0_19 = arith.constant 0 : index
    %c16 = arith.constant 16 : index
    %47 = vector.load %arg15[%c0_19, %c16] : memref<16x32xf32, #tpu.memory_space<vmem>>, vector<8x16xf32>
    tpu.vector_store %arg15[%c0_19, %c16], %46 {strides = array<i32>} : memref<16x32xf32, #tpu.memory_space<vmem>>, vector<8x16xf32>,
    %48 = vector.extract_strided_slice %6 {offsets = [1, 0], sizes = [1, 8], strides = [1, 1]} : vector<2x8xf32> to vector<1x8xf32>
    %49 = vector.extract_strided_slice %5 {offsets = [8, 0], sizes = [8, 16], strides = [1, 1]} : vector<16x96xf32> to vector<8x16xf32>
    %50 = vector.extract_strided_slice %5 {offsets = [8, 32], sizes = [8, 16], strides = [1, 1]} : vector<16x96xf32> to vector<8x16xf32>
    %51 = vector.extract_strided_slice %5 {offsets = [8, 64], sizes = [8, 16], strides = [1, 1]} : vector<16x96xf32> to vector<8x16xf32>
    %cst_20 = arith.constant dense<0.000000e+00> : vector<8x8xf32>
    %52 = tpu.matmul %49, %50, %cst_20 {dimension_numbers = #tpu.dot_dimension_numbers<[1], [1], [0], [0], [0, 0, 1, 0], [], []>} : vector<8x16xf32>, vector<8x16xf32>, vector<8x8xf32> -> vector<8x8xf32>
    %cst_21 = arith.constant 2.500000e-01 : f32
    %53 = vector.broadcast %cst_21 : f32 to vector<8x8xf32>
    %54 = arith.mulf %52, %53 : vector<8x8xf32>
    %55 = vector.broadcast %48 : vector<1x8xf32> to vector<8x8xf32>
    %56 = arith.addf %54, %55 : vector<8x8xf32>
    %cst_22 = arith.constant dense<0xFF800000> : vector<8xf32>
    %57 = vector.multi_reduction <maximumf>, %56, %cst_22 [1] : vector<8x8xf32> to vector<8xf32>
    %58 = vector.shape_cast %57 : vector<8xf32> to vector<8x1xf32>
    %59 = vector.broadcast %58 : vector<8x1xf32> to vector<8x8xf32>
    %60 = arith.subf %56, %59 : vector<8x8xf32>
    %61 = math.exp %60 : vector<8x8xf32>
    %cst_23 = arith.constant dense<0.000000e+00> : vector<8xf32>
    %62 = vector.multi_reduction <add>, %61, %cst_23 [1] : vector<8x8xf32> to vector<8xf32>
    %63 = vector.shape_cast %62 : vector<8xf32> to vector<8x1xf32>
    %64 = tpu.reciprocal %63 {approx = true} : vector<8x1xf32> -> vector<8x1xf32>
    %65 = vector.broadcast %64 : vector<8x1xf32> to vector<8x8xf32>
    %66 = arith.mulf %61, %65 : vector<8x8xf32>
    %cst_24 = arith.constant dense<0.000000e+00> : vector<8x16xf32>
    %67 = tpu.matmul %66, %51, %cst_24 {dimension_numbers = #tpu.dot_dimension_numbers<[1], [0], [0], [1], [0, 0, 1, 1], [], []>} : vector<8x8xf32>, vector<8x16xf32>, vector<8x16xf32> -> vector<8x16xf32>
    %c8 = arith.constant 8 : index
    %c0_25 = arith.constant 0 : index
    %68 = vector.load %arg15[%c8, %c0_25] : memref<16x32xf32, #tpu.memory_space<vmem>>, vector<8x16xf32>
    tpu.vector_store %arg15[%c8, %c0_25], %67 {strides = array<i32>} : memref<16x32xf32, #tpu.memory_space<vmem>>, vector<8x16xf32>,
    %69 = vector.extract_strided_slice %5 {offsets = [8, 16], sizes = [8, 16], strides = [1, 1]} : vector<16x96xf32> to vector<8x16xf32>
    %70 = vector.extract_strided_slice %5 {offsets = [8, 48], sizes = [8, 16], strides = [1, 1]} : vector<16x96xf32> to vector<8x16xf32>
    %71 = vector.extract_strided_slice %5 {offsets = [8, 80], sizes = [8, 16], strides = [1, 1]} : vector<16x96xf32> to vector<8x16xf32>
    %cst_26 = arith.constant dense<0.000000e+00> : vector<8x8xf32>
    %72 = tpu.matmul %69, %70, %cst_26 {dimension_numbers = #tpu.dot_dimension_numbers<[1], [1], [0], [0], [0, 0, 1, 0], [], []>} : vector<8x16xf32>, vector<8x16xf32>, vector<8x8xf32> -> vector<8x8xf32>
    %cst_27 = arith.constant 2.500000e-01 : f32
    %73 = vector.broadcast %cst_27 : f32 to vector<8x8xf32>
    %74 = arith.mulf %72, %73 : vector<8x8xf32>
    %75 = vector.broadcast %48 : vector<1x8xf32> to vector<8x8xf32>
    %76 = arith.addf %74, %75 : vector<8x8xf32>
    %cst_28 = arith.constant dense<0xFF800000> : vector<8xf32>
    %77 = vector.multi_reduction <maximumf>, %76, %cst_28 [1] : vector<8x8xf32> to vector<8xf32>
    %78 = vector.shape_cast %77 : vector<8xf32> to vector<8x1xf32>
    %79 = vector.broadcast %78 : vector<8x1xf32> to vector<8x8xf32>
    %80 = arith.subf %76, %79 : vector<8x8xf32>
    %81 = math.exp %80 : vector<8x8xf32>
    %cst_29 = arith.constant dense<0.000000e+00> : vector<8xf32>
    %82 = vector.multi_reduction <add>, %81, %cst_29 [1] : vector<8x8xf32> to vector<8xf32>
    %83 = vector.shape_cast %82 : vector<8xf32> to vector<8x1xf32>
    %84 = tpu.reciprocal %83 {approx = true} : vector<8x1xf32> -> vector<8x1xf32>
    %85 = vector.broadcast %84 : vector<8x1xf32> to vector<8x8xf32>
    %86 = arith.mulf %81, %85 : vector<8x8xf32>
    %cst_30 = arith.constant dense<0.000000e+00> : vector<8x16xf32>
    %87 = tpu.matmul %86, %71, %cst_30 {dimension_numbers = #tpu.dot_dimension_numbers<[1], [0], [0], [1], [0, 0, 1, 1], [], []>} : vector<8x8xf32>, vector<8x16xf32>, vector<8x16xf32> -> vector<8x16xf32>
    %c8_31 = arith.constant 8 : index
    %c16_32 = arith.constant 16 : index
    %88 = vector.load %arg15[%c8_31, %c16_32] : memref<16x32xf32, #tpu.memory_space<vmem>>, vector<8x16xf32>
    tpu.vector_store %arg15[%c8_31, %c16_32], %87 {strides = array<i32>} : memref<16x32xf32, #tpu.memory_space<vmem>>, vector<8x16xf32>,
    %c0_33 = arith.constant 0 : index
    %c0_34 = arith.constant 0 : index
    %89 = vector.load %arg15[%c0_33, %c0_34] : memref<16x32xf32, #tpu.memory_space<vmem>>, vector<16x32xf32>
    %c0_35 = arith.constant 0 : index
    %c0_36 = arith.constant 0 : index
    %90 = vector.load %arg4[%c0_35, %c0_36] : memref<32x32xf32, #tpu.memory_space<vmem>>, vector<32x32xf32>
    %cst_37 = arith.constant dense<0.000000e+00> : vector<16x32xf32>
    %91 = tpu.matmul %89, %90, %cst_37 {dimension_numbers = #tpu.dot_dimension_numbers<[1], [0], [0], [1], [0, 0, 1, 1], [], []>} : vector<16x32xf32>, vector<32x32xf32>, vector<16x32xf32> -> vector<16x32xf32>
    %c0_38 = arith.constant 0 : index
    %c0_39 = arith.constant 0 : index
    %92 = vector.load %arg5[%c0_38, %c0_39] : memref<1x32xf32, #tpu.memory_space<vmem>>, vector<1x32xf32>
    %93 = vector.broadcast %92 : vector<1x32xf32> to vector<16x32xf32>
    %94 = arith.addf %91, %93 : vector<16x32xf32>
    %95 = arith.addf %94, %0 : vector<16x32xf32>
    %c0_40 = arith.constant 0 : index
    %c0_41 = arith.constant 0 : index
    %96 = vector.load %arg6[%c0_40, %c0_41] : memref<1x32xf32, #tpu.memory_space<vmem>>, vector<1x32xf32>
    %c0_42 = arith.constant 0 : index
    %c0_43 = arith.constant 0 : index
    %97 = vector.load %arg7[%c0_42, %c0_43] : memref<1x32xf32, #tpu.memory_space<vmem>>, vector<1x32xf32>
    %cst_44 = arith.constant dense<0.000000e+00> : vector<16xf32>
    %98 = vector.multi_reduction <add>, %95, %cst_44 [1] : vector<16x32xf32> to vector<16xf32>
    %99 = vector.shape_cast %98 : vector<16xf32> to vector<16x1xf32>
    %cst_45 = arith.constant 3.200000e+01 : f32
    %100 = vector.broadcast %cst_45 : f32 to vector<16x1xf32>
    %101 = arith.divf %99, %100 : vector<16x1xf32>
    %102 = vector.broadcast %101 : vector<16x1xf32> to vector<16x32xf32>
    %103 = arith.subf %95, %102 : vector<16x32xf32>
    %104 = arith.mulf %103, %103 : vector<16x32xf32>
    %cst_46 = arith.constant dense<0.000000e+00> : vector<16xf32>
    %105 = vector.multi_reduction <add>, %104, %cst_46 [1] : vector<16x32xf32> to vector<16xf32>
    %106 = vector.shape_cast %105 : vector<16xf32> to vector<16x1xf32>
    %cst_47 = arith.constant 3.200000e+01 : f32
    %107 = vector.broadcast %cst_47 : f32 to vector<16x1xf32>
    %108 = arith.divf %106, %107 : vector<16x1xf32>
    %cst_48 = arith.constant 9.99999996E-13 : f32
    %109 = vector.broadcast %cst_48 : f32 to vector<16x1xf32>
    %110 = arith.addf %108, %109 : vector<16x1xf32>
    %111 = math.rsqrt %110 : vector<16x1xf32>
    %112 = vector.broadcast %111 : vector<16x1xf32> to vector<16x32xf32>
    %113 = arith.mulf %103, %112 : vector<16x32xf32>
    %114 = vector.broadcast %96 : vector<1x32xf32> to vector<16x32xf32>
    %115 = arith.mulf %113, %114 : vector<16x32xf32>
    %116 = vector.broadcast %97 : vector<1x32xf32> to vector<16x32xf32>
    %117 = arith.addf %115, %116 : vector<16x32xf32>
    %c0_49 = arith.constant 0 : index
    %c0_50 = arith.constant 0 : index
    %118 = vector.load %arg8[%c0_49, %c0_50] : memref<32x64xf32, #tpu.memory_space<vmem>>, vector<32x64xf32>
    %cst_51 = arith.constant dense<0.000000e+00> : vector<16x64xf32>
    %119 = tpu.matmul %117, %118, %cst_51 {dimension_numbers = #tpu.dot_dimension_numbers<[1], [0], [0], [1], [0, 0, 1, 1], [], []>} : vector<16x32xf32>, vector<32x64xf32>, vector<16x64xf32> -> vector<16x64xf32>
    %c0_52 = arith.constant 0 : index
    %c0_53 = arith.constant 0 : index
    %120 = vector.load %arg9[%c0_52, %c0_53] : memref<1x64xf32, #tpu.memory_space<vmem>>, vector<1x64xf32>
    %121 = vector.broadcast %120 : vector<1x64xf32> to vector<16x64xf32>
    %122 = arith.addf %119, %121 : vector<16x64xf32>
    %cst_54 = arith.constant 5.000000e-01 : f32
    %123 = vector.broadcast %cst_54 : f32 to vector<16x64xf32>
    %124 = arith.mulf %123, %122 : vector<16x64xf32>
    %cst_55 = arith.constant 4.471500e-02 : f32
    %125 = vector.broadcast %cst_55 : f32 to vector<16x64xf32>
    %126 = arith.mulf %125, %122 : vector<16x64xf32>
    %127 = arith.mulf %126, %122 : vector<16x64xf32>
    %128 = arith.mulf %127, %122 : vector<16x64xf32>
    %129 = arith.addf %122, %128 : vector<16x64xf32>
    %cst_56 = arith.constant 0.797884583 : f32
    %130 = vector.broadcast %cst_56 : f32 to vector<16x64xf32>
    %131 = arith.mulf %130, %129 : vector<16x64xf32>
    %132 = math.tanh %131 : vector<16x64xf32>
    %cst_57 = arith.constant 1.000000e+00 : f32
    %133 = vector.broadcast %cst_57 : f32 to vector<16x64xf32>
    %134 = arith.addf %133, %132 : vector<16x64xf32>
    %135 = arith.mulf %124, %134 : vector<16x64xf32>
    %c0_58 = arith.constant 0 : index
    %c0_59 = arith.constant 0 : index
    %136 = vector.load %arg10[%c0_58, %c0_59] : memref<64x32xf32, #tpu.memory_space<vmem>>, vector<64x32xf32>
    %cst_60 = arith.constant dense<0.000000e+00> : vector<16x32xf32>
    %137 = tpu.matmul %135, %136, %cst_60 {dimension_numbers = #tpu.dot_dimension_numbers<[1], [0], [0], [1], [0, 0, 1, 1], [], []>} : vector<16x64xf32>, vector<64x32xf32>, vector<16x32xf32> -> vector<16x32xf32>
    %c0_61 = arith.constant 0 : index
    %c0_62 = arith.constant 0 : index
    %138 = vector.load %arg11[%c0_61, %c0_62] : memref<1x32xf32, #tpu.memory_space<vmem>>, vector<1x32xf32>
    %139 = vector.broadcast %138 : vector<1x32xf32> to vector<16x32xf32>
    %140 = arith.addf %137, %139 : vector<16x32xf32>
    %141 = arith.addf %140, %117 : vector<16x32xf32>
    %c0_63 = arith.constant 0 : index
    %c0_64 = arith.constant 0 : index
    %142 = vector.load %arg12[%c0_63, %c0_64] : memref<1x32xf32, #tpu.memory_space<vmem>>, vector<1x32xf32>
    %c0_65 = arith.constant 0 : index
    %c0_66 = arith.constant 0 : index
    %143 = vector.load %arg13[%c0_65, %c0_66] : memref<1x32xf32, #tpu.memory_space<vmem>>, vector<1x32xf32>
    %cst_67 = arith.constant dense<0.000000e+00> : vector<16xf32>
    %144 = vector.multi_reduction <add>, %141, %cst_67 [1] : vector<16x32xf32> to vector<16xf32>
    %145 = vector.shape_cast %144 : vector<16xf32> to vector<16x1xf32>
    %cst_68 = arith.constant 3.200000e+01 : f32
    %146 = vector.broadcast %cst_68 : f32 to vector<16x1xf32>
    %147 = arith.divf %145, %146 : vector<16x1xf32>
    %148 = vector.broadcast %147 : vector<16x1xf32> to vector<16x32xf32>
    %149 = arith.subf %141, %148 : vector<16x32xf32>
    %150 = arith.mulf %149, %149 : vector<16x32xf32>
    %cst_69 = arith.constant dense<0.000000e+00> : vector<16xf32>
    %151 = vector.multi_reduction <add>, %150, %cst_69 [1] : vector<16x32xf32> to vector<16xf32>
    %152 = vector.shape_cast %151 : vector<16xf32> to vector<16x1xf32>
    %cst_70 = arith.constant 3.200000e+01 : f32
    %153 = vector.broadcast %cst_70 : f32 to vector<16x1xf32>
    %154 = arith.divf %152, %153 : vector<16x1xf32>
    %cst_71 = arith.constant 9.99999996E-13 : f32
    %155 = vector.broadcast %cst_71 : f32 to vector<16x1xf32>
    %156 = arith.addf %154, %155 : vector<16x1xf32>
    %157 = math.rsqrt %156 : vector<16x1xf32>
    %158 = vector.broadcast %157 : vector<16x1xf32> to vector<16x32xf32>
    %159 = arith.mulf %149, %158 : vector<16x32xf32>
    %160 = vector.broadcast %142 : vector<1x32xf32> to vector<16x32xf32>
    %161 = arith.mulf %159, %160 : vector<16x32xf32>
    %162 = vector.broadcast %143 : vector<1x32xf32> to vector<16x32xf32>
    %163 = arith.addf %161, %162 : vector<16x32xf32>
    %c0_72 = arith.constant 0 : index
    %c0_73 = arith.constant 0 : index
    %164 = vector.load %arg14[%c0_72, %c0_73] : memref<16x32xf32, #tpu.memory_space<vmem>>, vector<16x32xf32>
    tpu.vector_store %arg14[%c0_72, %c0_73], %163 {strides = array<i32>} : memref<16x32xf32, #tpu.memory_space<vmem>>, vector<16x32xf32>,
    return
  }
}

module attributes {stable_mosaic.version = 11 : i64} {
  func.func @_fused_layer_kernel(%arg0: memref<16x32xf32, #tpu.memory_space<vmem>>, %arg1: memref<2x8xf32, #tpu.memory_space<vmem>>, %arg2: memref<32x96xf32, #tpu.memory_space<vmem>>, %arg3: memref<1x96xf32, #tpu.memory_space<vmem>>, %arg4: memref<32x32xf32, #tpu.memory_space<vmem>>, %arg5: memref<1x32xf32, #tpu.memory_space<vmem>>, %arg6: memref<1x32xf32, #tpu.memory_space<vmem>>, %arg7: memref<1x32xf32, #tpu.memory_space<vmem>>, %arg8: memref<32x64xf32, #tpu.memory_space<vmem>>, %arg9: memref<1x64xf32, #tpu.memory_space<vmem>>, %arg10: memref<64x32xf32, #tpu.memory_space<vmem>>, %arg11: memref<1x32xf32, #tpu.memory_space<vmem>>, %arg12: memref<1x32xf32, #tpu.memory_space<vmem>>, %arg13: memref<1x32xf32, #tpu.memory_space<vmem>>, %arg14: memref<32x32xf32, #tpu.memory_space<vmem>>, %arg15: memref<1x32xf32, #tpu.memory_space<vmem>>, %arg16: memref<32x3xf32, #tpu.memory_space<vmem>>, %arg17: memref<1x3xf32, #tpu.memory_space<vmem>>, %arg18: memref<16x3xf32, #tpu.memory_space<vmem>>, %arg19: memref<16x32xf32, #tpu.memory_space<vmem>>) attributes {dimension_semantics = [], scalar_prefetch = 0 : i64, scratch_operands = 1 : i64, tpu.core_type = #tpu.core_type<tc>} {
    %c0 = arith.constant 0 : index
    %c0_0 = arith.constant 0 : index
    %0 = vector.load %arg0[%c0, %c0_0] : memref<16x32xf32, #tpu.memory_space<vmem>>, vector<16x32xf32>
    %c0_1 = arith.constant 0 : index
    %c0_2 = arith.constant 0 : index
    %1 = vector.load %arg2[%c0_1, %c0_2] : memref<32x96xf32, #tpu.memory_space<vmem>>, vector<32x96xf32>
    %cst = arith.constant dense<0.000000e+00> : vector<16x96xf32>
    %2 = tpu.matmul %0, %1, %cst {dimension_numbers = #tpu.dot_dimension_numbers<[1], [0], [0], [1], [0, 0, 1, 1], [], []>} : vector<16x32xf32>, vector<32x96xf32>, vector<16x96xf32> -> vector<16x96xf32>
    %c0_3 = arith.constant 0 : index
    %c0_4 = arith.constant 0 : index
    %3 = vector.load %arg3[%c0_3, %c0_4] : memref<1x96xf32, #tpu.memory_space<vmem>>, vector<1x96xf32>
    %4 = vector.broadcast %3 : vector<1x96xf32> to vector<16x96xf32>
    %5 = arith.addf %2, %4 : vector<16x96xf32>
    %c0_5 = arith.constant 0 : index
    %c0_6 = arith.constant 0 : index
    %6 = vector.load %arg1[%c0_5, %c0_6] : memref<2x8xf32, #tpu.memory_space<vmem>>, vector<2x8xf32>
    %7 = vector.extract_strided_slice %6 {offsets = [0, 0], sizes = [1, 8], strides = [1, 1]} : vector<2x8xf32> to vector<1x8xf32>
    %8 = vector.extract_strided_slice %5 {offsets = [0, 0], sizes = [8, 16], strides = [1, 1]} : vector<16x96xf32> to vector<8x16xf32>
    %9 = vector.extract_strided_slice %5 {offsets = [0, 32], sizes = [8, 16], strides = [1, 1]} : vector<16x96xf32> to vector<8x16xf32>
    %10 = vector.extract_strided_slice %5 {offsets = [0, 64], sizes = [8, 16], strides = [1, 1]} : vector<16x96xf32> to vector<8x16xf32>
    %cst_7 = arith.constant dense<0.000000e+00> : vector<8x8xf32>
    %11 = tpu.matmul %8, %9, %cst_7 {dimension_numbers = #tpu.dot_dimension_numbers<[1], [1], [0], [0], [0, 0, 1, 0], [], []>} : vector<8x16xf32>, vector<8x16xf32>, vector<8x8xf32> -> vector<8x8xf32>
    %cst_8 = arith.constant 2.500000e-01 : f32
    %12 = vector.broadcast %cst_8 : f32 to vector<8x8xf32>
    %13 = arith.mulf %11, %12 : vector<8x8xf32>
    %14 = vector.broadcast %7 : vector<1x8xf32> to vector<8x8xf32>
    %15 = arith.addf %13, %14 : vector<8x8xf32>
    %cst_9 = arith.constant dense<0xFF800000> : vector<8xf32>
    %16 = vector.multi_reduction <maximumf>, %15, %cst_9 [1] : vector<8x8xf32> to vector<8xf32>
    %17 = vector.shape_cast %16 : vector<8xf32> to vector<8x1xf32>
    %18 = vector.broadcast %17 : vector<8x1xf32> to vector<8x8xf32>
    %19 = arith.subf %15, %18 : vector<8x8xf32>
    %20 = math.exp %19 : vector<8x8xf32>
    %cst_10 = arith.constant dense<0.000000e+00> : vector<8xf32>
    %21 = vector.multi_reduction <add>, %20, %cst_10 [1] : vector<8x8xf32> to vector<8xf32>
    %22 = vector.shape_cast %21 : vector<8xf32> to vector<8x1xf32>
    %23 = tpu.reciprocal %22 {approx = true} : vector<8x1xf32> -> vector<8x1xf32>
    %24 = vector.broadcast %23 : vector<8x1xf32> to vector<8x8xf32>
    %25 = arith.mulf %20, %24 : vector<8x8xf32>
    %cst_11 = arith.constant dense<0.000000e+00> : vector<8x16xf32>
    %26 = tpu.matmul %25, %10, %cst_11 {dimension_numbers = #tpu.dot_dimension_numbers<[1], [0], [0], [1], [0, 0, 1, 1], [], []>} : vector<8x8xf32>, vector<8x16xf32>, vector<8x16xf32> -> vector<8x16xf32>
    %c0_12 = arith.constant 0 : index
    %c0_13 = arith.constant 0 : index
    %27 = vector.load %arg19[%c0_12, %c0_13] : memref<16x32xf32, #tpu.memory_space<vmem>>, vector<8x16xf32>
    tpu.vector_store %arg19[%c0_12, %c0_13], %26 {strides = array<i32>} : memref<16x32xf32, #tpu.memory_space<vmem>>, vector<8x16xf32>,
    %28 = vector.extract_strided_slice %5 {offsets = [0, 16], sizes = [8, 16], strides = [1, 1]} : vector<16x96xf32> to vector<8x16xf32>
    %29 = vector.extract_strided_slice %5 {offsets = [0, 48], sizes = [8, 16], strides = [1, 1]} : vector<16x96xf32> to vector<8x16xf32>
    %30 = vector.extract_strided_slice %5 {offsets = [0, 80], sizes = [8, 16], strides = [1, 1]} : vector<16x96xf32> to vector<8x16xf32>
    %cst_14 = arith.constant dense<0.000000e+00> : vector<8x8xf32>
    %31 = tpu.matmul %28, %29, %cst_14 {dimension_numbers = #tpu.dot_dimension_numbers<[1], [1], [0], [0], [0, 0, 1, 0], [], []>} : vector<8x16xf32>, vector<8x16xf32>, vector<8x8xf32> -> vector<8x8xf32>
    %cst_15 = arith.constant 2.500000e-01 : f32
    %32 = vector.broadcast %cst_15 : f32 to vector<8x8xf32>
    %33 = arith.mulf %31, %32 : vector<8x8xf32>
    %34 = vector.broadcast %7 : vector<1x8xf32> to vector<8x8xf32>
    %35 = arith.addf %33, %34 : vector<8x8xf32>
    %cst_16 = arith.constant dense<0xFF800000> : vector<8xf32>
    %36 = vector.multi_reduction <maximumf>, %35, %cst_16 [1] : vector<8x8xf32> to vector<8xf32>
    %37 = vector.shape_cast %36 : vector<8xf32> to vector<8x1xf32>
    %38 = vector.broadcast %37 : vector<8x1xf32> to vector<8x8xf32>
    %39 = arith.subf %35, %38 : vector<8x8xf32>
    %40 = math.exp %39 : vector<8x8xf32>
    %cst_17 = arith.constant dense<0.000000e+00> : vector<8xf32>
    %41 = vector.multi_reduction <add>, %40, %cst_17 [1] : vector<8x8xf32> to vector<8xf32>
    %42 = vector.shape_cast %41 : vector<8xf32> to vector<8x1xf32>
    %43 = tpu.reciprocal %42 {approx = true} : vector<8x1xf32> -> vector<8x1xf32>
    %44 = vector.broadcast %43 : vector<8x1xf32> to vector<8x8xf32>
    %45 = arith.mulf %40, %44 : vector<8x8xf32>
    %cst_18 = arith.constant dense<0.000000e+00> : vector<8x16xf32>
    %46 = tpu.matmul %45, %30, %cst_18 {dimension_numbers = #tpu.dot_dimension_numbers<[1], [0], [0], [1], [0, 0, 1, 1], [], []>} : vector<8x8xf32>, vector<8x16xf32>, vector<8x16xf32> -> vector<8x16xf32>
    %c0_19 = arith.constant 0 : index
    %c16 = arith.constant 16 : index
    %47 = vector.load %arg19[%c0_19, %c16] : memref<16x32xf32, #tpu.memory_space<vmem>>, vector<8x16xf32>
    tpu.vector_store %arg19[%c0_19, %c16], %46 {strides = array<i32>} : memref<16x32xf32, #tpu.memory_space<vmem>>, vector<8x16xf32>,
    %48 = vector.extract_strided_slice %6 {offsets = [1, 0], sizes = [1, 8], strides = [1, 1]} : vector<2x8xf32> to vector<1x8xf32>
    %49 = vector.extract_strided_slice %5 {offsets = [8, 0], sizes = [8, 16], strides = [1, 1]} : vector<16x96xf32> to vector<8x16xf32>
    %50 = vector.extract_strided_slice %5 {offsets = [8, 32], sizes = [8, 16], strides = [1, 1]} : vector<16x96xf32> to vector<8x16xf32>
    %51 = vector.extract_strided_slice %5 {offsets = [8, 64], sizes = [8, 16], strides = [1, 1]} : vector<16x96xf32> to vector<8x16xf32>
    %cst_20 = arith.constant dense<0.000000e+00> : vector<8x8xf32>
    %52 = tpu.matmul %49, %50, %cst_20 {dimension_numbers = #tpu.dot_dimension_numbers<[1], [1], [0], [0], [0, 0, 1, 0], [], []>} : vector<8x16xf32>, vector<8x16xf32>, vector<8x8xf32> -> vector<8x8xf32>
    %cst_21 = arith.constant 2.500000e-01 : f32
    %53 = vector.broadcast %cst_21 : f32 to vector<8x8xf32>
    %54 = arith.mulf %52, %53 : vector<8x8xf32>
    %55 = vector.broadcast %48 : vector<1x8xf32> to vector<8x8xf32>
    %56 = arith.addf %54, %55 : vector<8x8xf32>
    %cst_22 = arith.constant dense<0xFF800000> : vector<8xf32>
    %57 = vector.multi_reduction <maximumf>, %56, %cst_22 [1] : vector<8x8xf32> to vector<8xf32>
    %58 = vector.shape_cast %57 : vector<8xf32> to vector<8x1xf32>
    %59 = vector.broadcast %58 : vector<8x1xf32> to vector<8x8xf32>
    %60 = arith.subf %56, %59 : vector<8x8xf32>
    %61 = math.exp %60 : vector<8x8xf32>
    %cst_23 = arith.constant dense<0.000000e+00> : vector<8xf32>
    %62 = vector.multi_reduction <add>, %61, %cst_23 [1] : vector<8x8xf32> to vector<8xf32>
    %63 = vector.shape_cast %62 : vector<8xf32> to vector<8x1xf32>
    %64 = tpu.reciprocal %63 {approx = true} : vector<8x1xf32> -> vector<8x1xf32>
    %65 = vector.broadcast %64 : vector<8x1xf32> to vector<8x8xf32>
    %66 = arith.mulf %61, %65 : vector<8x8xf32>
    %cst_24 = arith.constant dense<0.000000e+00> : vector<8x16xf32>
    %67 = tpu.matmul %66, %51, %cst_24 {dimension_numbers = #tpu.dot_dimension_numbers<[1], [0], [0], [1], [0, 0, 1, 1], [], []>} : vector<8x8xf32>, vector<8x16xf32>, vector<8x16xf32> -> vector<8x16xf32>
    %c8 = arith.constant 8 : index
    %c0_25 = arith.constant 0 : index
    %68 = vector.load %arg19[%c8, %c0_25] : memref<16x32xf32, #tpu.memory_space<vmem>>, vector<8x16xf32>
    tpu.vector_store %arg19[%c8, %c0_25], %67 {strides = array<i32>} : memref<16x32xf32, #tpu.memory_space<vmem>>, vector<8x16xf32>,
    %69 = vector.extract_strided_slice %5 {offsets = [8, 16], sizes = [8, 16], strides = [1, 1]} : vector<16x96xf32> to vector<8x16xf32>
    %70 = vector.extract_strided_slice %5 {offsets = [8, 48], sizes = [8, 16], strides = [1, 1]} : vector<16x96xf32> to vector<8x16xf32>
    %71 = vector.extract_strided_slice %5 {offsets = [8, 80], sizes = [8, 16], strides = [1, 1]} : vector<16x96xf32> to vector<8x16xf32>
    %cst_26 = arith.constant dense<0.000000e+00> : vector<8x8xf32>
    %72 = tpu.matmul %69, %70, %cst_26 {dimension_numbers = #tpu.dot_dimension_numbers<[1], [1], [0], [0], [0, 0, 1, 0], [], []>} : vector<8x16xf32>, vector<8x16xf32>, vector<8x8xf32> -> vector<8x8xf32>
    %cst_27 = arith.constant 2.500000e-01 : f32
    %73 = vector.broadcast %cst_27 : f32 to vector<8x8xf32>
    %74 = arith.mulf %72, %73 : vector<8x8xf32>
    %75 = vector.broadcast %48 : vector<1x8xf32> to vector<8x8xf32>
    %76 = arith.addf %74, %75 : vector<8x8xf32>
    %cst_28 = arith.constant dense<0xFF800000> : vector<8xf32>
    %77 = vector.multi_reduction <maximumf>, %76, %cst_28 [1] : vector<8x8xf32> to vector<8xf32>
    %78 = vector.shape_cast %77 : vector<8xf32> to vector<8x1xf32>
    %79 = vector.broadcast %78 : vector<8x1xf32> to vector<8x8xf32>
    %80 = arith.subf %76, %79 : vector<8x8xf32>
    %81 = math.exp %80 : vector<8x8xf32>
    %cst_29 = arith.constant dense<0.000000e+00> : vector<8xf32>
    %82 = vector.multi_reduction <add>, %81, %cst_29 [1] : vector<8x8xf32> to vector<8xf32>
    %83 = vector.shape_cast %82 : vector<8xf32> to vector<8x1xf32>
    %84 = tpu.reciprocal %83 {approx = true} : vector<8x1xf32> -> vector<8x1xf32>
    %85 = vector.broadcast %84 : vector<8x1xf32> to vector<8x8xf32>
    %86 = arith.mulf %81, %85 : vector<8x8xf32>
    %cst_30 = arith.constant dense<0.000000e+00> : vector<8x16xf32>
    %87 = tpu.matmul %86, %71, %cst_30 {dimension_numbers = #tpu.dot_dimension_numbers<[1], [0], [0], [1], [0, 0, 1, 1], [], []>} : vector<8x8xf32>, vector<8x16xf32>, vector<8x16xf32> -> vector<8x16xf32>
    %c8_31 = arith.constant 8 : index
    %c16_32 = arith.constant 16 : index
    %88 = vector.load %arg19[%c8_31, %c16_32] : memref<16x32xf32, #tpu.memory_space<vmem>>, vector<8x16xf32>
    tpu.vector_store %arg19[%c8_31, %c16_32], %87 {strides = array<i32>} : memref<16x32xf32, #tpu.memory_space<vmem>>, vector<8x16xf32>,
    %c0_33 = arith.constant 0 : index
    %c0_34 = arith.constant 0 : index
    %89 = vector.load %arg19[%c0_33, %c0_34] : memref<16x32xf32, #tpu.memory_space<vmem>>, vector<16x32xf32>
    %c0_35 = arith.constant 0 : index
    %c0_36 = arith.constant 0 : index
    %90 = vector.load %arg4[%c0_35, %c0_36] : memref<32x32xf32, #tpu.memory_space<vmem>>, vector<32x32xf32>
    %cst_37 = arith.constant dense<0.000000e+00> : vector<16x32xf32>
    %91 = tpu.matmul %89, %90, %cst_37 {dimension_numbers = #tpu.dot_dimension_numbers<[1], [0], [0], [1], [0, 0, 1, 1], [], []>} : vector<16x32xf32>, vector<32x32xf32>, vector<16x32xf32> -> vector<16x32xf32>
    %c0_38 = arith.constant 0 : index
    %c0_39 = arith.constant 0 : index
    %92 = vector.load %arg5[%c0_38, %c0_39] : memref<1x32xf32, #tpu.memory_space<vmem>>, vector<1x32xf32>
    %93 = vector.broadcast %92 : vector<1x32xf32> to vector<16x32xf32>
    %94 = arith.addf %91, %93 : vector<16x32xf32>
    %95 = arith.addf %94, %0 : vector<16x32xf32>
    %c0_40 = arith.constant 0 : index
    %c0_41 = arith.constant 0 : index
    %96 = vector.load %arg6[%c0_40, %c0_41] : memref<1x32xf32, #tpu.memory_space<vmem>>, vector<1x32xf32>
    %c0_42 = arith.constant 0 : index
    %c0_43 = arith.constant 0 : index
    %97 = vector.load %arg7[%c0_42, %c0_43] : memref<1x32xf32, #tpu.memory_space<vmem>>, vector<1x32xf32>
    %cst_44 = arith.constant dense<0.000000e+00> : vector<16xf32>
    %98 = vector.multi_reduction <add>, %95, %cst_44 [1] : vector<16x32xf32> to vector<16xf32>
    %99 = vector.shape_cast %98 : vector<16xf32> to vector<16x1xf32>
    %cst_45 = arith.constant 3.200000e+01 : f32
    %100 = vector.broadcast %cst_45 : f32 to vector<16x1xf32>
    %101 = arith.divf %99, %100 : vector<16x1xf32>
    %102 = vector.broadcast %101 : vector<16x1xf32> to vector<16x32xf32>
    %103 = arith.subf %95, %102 : vector<16x32xf32>
    %104 = arith.mulf %103, %103 : vector<16x32xf32>
    %cst_46 = arith.constant dense<0.000000e+00> : vector<16xf32>
    %105 = vector.multi_reduction <add>, %104, %cst_46 [1] : vector<16x32xf32> to vector<16xf32>
    %106 = vector.shape_cast %105 : vector<16xf32> to vector<16x1xf32>
    %cst_47 = arith.constant 3.200000e+01 : f32
    %107 = vector.broadcast %cst_47 : f32 to vector<16x1xf32>
    %108 = arith.divf %106, %107 : vector<16x1xf32>
    %cst_48 = arith.constant 9.99999996E-13 : f32
    %109 = vector.broadcast %cst_48 : f32 to vector<16x1xf32>
    %110 = arith.addf %108, %109 : vector<16x1xf32>
    %111 = math.rsqrt %110 : vector<16x1xf32>
    %112 = vector.broadcast %111 : vector<16x1xf32> to vector<16x32xf32>
    %113 = arith.mulf %103, %112 : vector<16x32xf32>
    %114 = vector.broadcast %96 : vector<1x32xf32> to vector<16x32xf32>
    %115 = arith.mulf %113, %114 : vector<16x32xf32>
    %116 = vector.broadcast %97 : vector<1x32xf32> to vector<16x32xf32>
    %117 = arith.addf %115, %116 : vector<16x32xf32>
    %c0_49 = arith.constant 0 : index
    %c0_50 = arith.constant 0 : index
    %118 = vector.load %arg8[%c0_49, %c0_50] : memref<32x64xf32, #tpu.memory_space<vmem>>, vector<32x64xf32>
    %cst_51 = arith.constant dense<0.000000e+00> : vector<16x64xf32>
    %119 = tpu.matmul %117, %118, %cst_51 {dimension_numbers = #tpu.dot_dimension_numbers<[1], [0], [0], [1], [0, 0, 1, 1], [], []>} : vector<16x32xf32>, vector<32x64xf32>, vector<16x64xf32> -> vector<16x64xf32>
    %c0_52 = arith.constant 0 : index
    %c0_53 = arith.constant 0 : index
    %120 = vector.load %arg9[%c0_52, %c0_53] : memref<1x64xf32, #tpu.memory_space<vmem>>, vector<1x64xf32>
    %121 = vector.broadcast %120 : vector<1x64xf32> to vector<16x64xf32>
    %122 = arith.addf %119, %121 : vector<16x64xf32>
    %cst_54 = arith.constant 5.000000e-01 : f32
    %123 = vector.broadcast %cst_54 : f32 to vector<16x64xf32>
    %124 = arith.mulf %123, %122 : vector<16x64xf32>
    %cst_55 = arith.constant 4.471500e-02 : f32
    %125 = vector.broadcast %cst_55 : f32 to vector<16x64xf32>
    %126 = arith.mulf %125, %122 : vector<16x64xf32>
    %127 = arith.mulf %126, %122 : vector<16x64xf32>
    %128 = arith.mulf %127, %122 : vector<16x64xf32>
    %129 = arith.addf %122, %128 : vector<16x64xf32>
    %cst_56 = arith.constant 0.797884583 : f32
    %130 = vector.broadcast %cst_56 : f32 to vector<16x64xf32>
    %131 = arith.mulf %130, %129 : vector<16x64xf32>
    %132 = math.tanh %131 : vector<16x64xf32>
    %cst_57 = arith.constant 1.000000e+00 : f32
    %133 = vector.broadcast %cst_57 : f32 to vector<16x64xf32>
    %134 = arith.addf %133, %132 : vector<16x64xf32>
    %135 = arith.mulf %124, %134 : vector<16x64xf32>
    %c0_58 = arith.constant 0 : index
    %c0_59 = arith.constant 0 : index
    %136 = vector.load %arg10[%c0_58, %c0_59] : memref<64x32xf32, #tpu.memory_space<vmem>>, vector<64x32xf32>
    %cst_60 = arith.constant dense<0.000000e+00> : vector<16x32xf32>
    %137 = tpu.matmul %135, %136, %cst_60 {dimension_numbers = #tpu.dot_dimension_numbers<[1], [0], [0], [1], [0, 0, 1, 1], [], []>} : vector<16x64xf32>, vector<64x32xf32>, vector<16x32xf32> -> vector<16x32xf32>
    %c0_61 = arith.constant 0 : index
    %c0_62 = arith.constant 0 : index
    %138 = vector.load %arg11[%c0_61, %c0_62] : memref<1x32xf32, #tpu.memory_space<vmem>>, vector<1x32xf32>
    %139 = vector.broadcast %138 : vector<1x32xf32> to vector<16x32xf32>
    %140 = arith.addf %137, %139 : vector<16x32xf32>
    %141 = arith.addf %140, %117 : vector<16x32xf32>
    %c0_63 = arith.constant 0 : index
    %c0_64 = arith.constant 0 : index
    %142 = vector.load %arg12[%c0_63, %c0_64] : memref<1x32xf32, #tpu.memory_space<vmem>>, vector<1x32xf32>
    %c0_65 = arith.constant 0 : index
    %c0_66 = arith.constant 0 : index
    %143 = vector.load %arg13[%c0_65, %c0_66] : memref<1x32xf32, #tpu.memory_space<vmem>>, vector<1x32xf32>
    %cst_67 = arith.constant dense<0.000000e+00> : vector<16xf32>
    %144 = vector.multi_reduction <add>, %141, %cst_67 [1] : vector<16x32xf32> to vector<16xf32>
    %145 = vector.shape_cast %144 : vector<16xf32> to vector<16x1xf32>
    %cst_68 = arith.constant 3.200000e+01 : f32
    %146 = vector.broadcast %cst_68 : f32 to vector<16x1xf32>
    %147 = arith.divf %145, %146 : vector<16x1xf32>
    %148 = vector.broadcast %147 : vector<16x1xf32> to vector<16x32xf32>
    %149 = arith.subf %141, %148 : vector<16x32xf32>
    %150 = arith.mulf %149, %149 : vector<16x32xf32>
    %cst_69 = arith.constant dense<0.000000e+00> : vector<16xf32>
    %151 = vector.multi_reduction <add>, %150, %cst_69 [1] : vector<16x32xf32> to vector<16xf32>
    %152 = vector.shape_cast %151 : vector<16xf32> to vector<16x1xf32>
    %cst_70 = arith.constant 3.200000e+01 : f32
    %153 = vector.broadcast %cst_70 : f32 to vector<16x1xf32>
    %154 = arith.divf %152, %153 : vector<16x1xf32>
    %cst_71 = arith.constant 9.99999996E-13 : f32
    %155 = vector.broadcast %cst_71 : f32 to vector<16x1xf32>
    %156 = arith.addf %154, %155 : vector<16x1xf32>
    %157 = math.rsqrt %156 : vector<16x1xf32>
    %158 = vector.broadcast %157 : vector<16x1xf32> to vector<16x32xf32>
    %159 = arith.mulf %149, %158 : vector<16x32xf32>
    %160 = vector.broadcast %142 : vector<1x32xf32> to vector<16x32xf32>
    %161 = arith.mulf %159, %160 : vector<16x32xf32>
    %162 = vector.broadcast %143 : vector<1x32xf32> to vector<16x32xf32>
    %163 = arith.addf %161, %162 : vector<16x32xf32>
    %c0_72 = arith.constant 0 : index
    %c0_73 = arith.constant 0 : index
    %164 = vector.load %arg14[%c0_72, %c0_73] : memref<32x32xf32, #tpu.memory_space<vmem>>, vector<32x32xf32>
    %cst_74 = arith.constant dense<0.000000e+00> : vector<16x32xf32>
    %165 = tpu.matmul %163, %164, %cst_74 {dimension_numbers = #tpu.dot_dimension_numbers<[1], [0], [0], [1], [0, 0, 1, 1], [], []>} : vector<16x32xf32>, vector<32x32xf32>, vector<16x32xf32> -> vector<16x32xf32>
    %c0_75 = arith.constant 0 : index
    %c0_76 = arith.constant 0 : index
    %166 = vector.load %arg15[%c0_75, %c0_76] : memref<1x32xf32, #tpu.memory_space<vmem>>, vector<1x32xf32>
    %167 = vector.broadcast %166 : vector<1x32xf32> to vector<16x32xf32>
    %168 = arith.addf %165, %167 : vector<16x32xf32>
    %169 = math.tanh %168 : vector<16x32xf32>
    %c0_77 = arith.constant 0 : index
    %c0_78 = arith.constant 0 : index
    %170 = vector.load %arg16[%c0_77, %c0_78] : memref<32x3xf32, #tpu.memory_space<vmem>>, vector<32x3xf32>
    %cst_79 = arith.constant dense<0.000000e+00> : vector<16x3xf32>
    %171 = tpu.matmul %169, %170, %cst_79 {dimension_numbers = #tpu.dot_dimension_numbers<[1], [0], [0], [1], [0, 0, 1, 1], [], []>} : vector<16x32xf32>, vector<32x3xf32>, vector<16x3xf32> -> vector<16x3xf32>
    %c0_80 = arith.constant 0 : index
    %c0_81 = arith.constant 0 : index
    %172 = vector.load %arg17[%c0_80, %c0_81] : memref<1x3xf32, #tpu.memory_space<vmem>>, vector<1x3xf32>
    %173 = vector.broadcast %172 : vector<1x3xf32> to vector<16x3xf32>
    %174 = arith.addf %171, %173 : vector<16x3xf32>
    %c0_82 = arith.constant 0 : index
    %c0_83 = arith.constant 0 : index
    %175 = vector.load %arg18[%c0_82, %c0_83] : memref<16x3xf32, #tpu.memory_space<vmem>>, vector<16x3xf32>
    tpu.vector_store %arg18[%c0_82, %c0_83], %174 {strides = array<i32>} : memref<16x3xf32, #tpu.memory_space<vmem>>, vector<16x3xf32>,
    return
  }
}

</mosaic_0001>

<bundles_post_ra>
// kernel: model_forward.3
= control target key start
LH: loop header
LB: loop body
LE: loop exit
PB: predicated region body
PF: predicated region fallthrough
CT: control target
= control target key end

     0   :  { %vm18_vm0 = vcmask 261120   ;;  %s118_s0 = inlined_call_operand.vmem [shape: f32[16,32], index: 0, kind: input, shape index: {}]   ;;  %s119_s1 = inlined_call_operand.vmem [shape: f32[1,32], index: 1, kind: input, shape index: {}]   ;;  %s120_s2 = inlined_call_operand.vmem [shape: f32[1,32], index: 2, kind: input, shape index: {}]   ;;  %s121_s3 = inlined_call_operand.vmem [shape: f32[16,32], index: 3, kind: output, shape index: {}]  }
   0x1   :  { %v14_v0 = vld [vmem:[%s118_s0] sm:$0xff]  ;;  %v15_v1 = vld [vmem:[%s118_s0 + $0x8] sm:$0xff] }
   0x2   :  { %v19_v2 = vsel %vm18_vm0, %v14_v0, 0.0  ;;  %v22_v3 = vsel %vm18_vm0, %v15_v1, 0.0  ;;  %v68_v21 = vld [vmem:[%s119_s1] ss:$0 sm:$0xff] }
   0x3   :  { %20 = vadd.xlane.f32.xlu0 %v19_v2  ;;  %v69_v23 = vld [vmem:[%s120_s2] ss:$0 sm:$0xff] }
   0x7   :  { %23 = vadd.xlane.f32.xlu0 %v22_v3 }
  0x8c   :  { %v21_v4 = vpop.xlane.xlu0 %20 }
  0x8d   :  { %v26_v5 = vmul.f32 0.03125, %v21_v4 }
  0x8f   :  { %v28_v6 = vsub.f32 %v14_v0, %v26_v5 }
  0x90   :  { %v24_v7 = vpop.xlane.xlu0 %23 }
  0x91   :  { %v27_v8 = vmul.f32 0.03125, %v24_v7  ;;  %v30_v9 = vmul.f32 %v28_v6, %v28_v6 }
  0x93   :  { %v29_v10 = vsub.f32 %v15_v1, %v27_v8  ;;  %v32_v11 = vsel %vm18_vm0, %v30_v9, 0.0 }
  0x94   :  { %33 = vadd.xlane.f32.xlu1 %v32_v11 }
  0x95   :  { %v31_v12 = vmul.f32 %v29_v10, %v29_v10 }
  0x97   :  { %v35_v13 = vsel %vm18_vm0, %v31_v12, 0.0 }
  0x98   :  { %36 = vadd.xlane.f32.xlu1 %v35_v13 }
 0x11d   :  { %v34_v14 = vpop.xlane.xlu1 %33 }
 0x11e   :  { %v38_v15 = vmul.f32 0.03125, %v34_v14 }
 0x120   :  { %v40_v16 = vadd.f32 1e-12, %v38_v15 }
 0x121   :  { %v37_v17 = vpop.xlane.xlu1 %36 }
 0x122   :  { %70 = vrsqrt.f32 %v40_v16  ;;  %v39_v18 = vmul.f32 0.03125, %v37_v17 }
 0x124   :  { %v41_v19 = vadd.f32 1e-12, %v39_v18 }
 0x126   :  { %72 = vrsqrt.f32 %v41_v19 }
 0x12f   :  { %v71_v20 = vpop.eup %70 }
 0x130   :  { %v44_v22 = vmul.f32 %v71_v20, %v28_v6 }
 0x132   :  { %v52_v24 = vmul.f32 %v68_v21, %v44_v22 }
 0x133   :  { %v73_v25 = vpop.eup %72 }
 0x134   :  { %v60_v26 = vadd.f32 %v69_v23, %v52_v24  ;;  %v45_v27 = vmul.f32 %v73_v25, %v29_v10 }
 0x136   :  { %62 = vst.msk [vmem:[%s121_s3] sm:$0xff] %vm18_vm0, %v60_v26  ;;  %v53_v28 = vmul.f32 %v68_v21, %v45_v27 }
 0x138   :  { %v61_v29 = vadd.f32 %v69_v23, %v53_v28 }
 0x13a   :  { %63 = vst.msk [vmem:[%s121_s3 + $0x8] sm:$0xff] %vm18_vm0, %v61_v29 }

// kernel: model_forward.4
= control target key start
LH: loop header
LB: loop body
LE: loop exit
PB: predicated region body
PF: predicated region fallthrough
CT: control target
= control target key end

     0   :  { %vm60_vm0 = vcmask 261120   ;;  %v1432_v6 = vmov 0.0   ;;  %vm1433_vm1 = vmmov 0   ;;  %s1434_s25 = smov 112   ;;  %s1435_s26 = smov 96   ;;  %vm146_vm2 = vcmask 130048   ;;  %s1706_s2 = inlined_call_operand.vmem [shape: f32[32,96], index: 2, kind: input, shape index: {}]   ;;  %s1707_s0 = inlined_call_operand.vmem [shape: f32[16,32], index: 0, kind: input, shape index: {}]   ;;  %s1708_s3 = inlined_call_operand.vmem [shape: f32[1,96], index: 3, kind: input, shape index: {}]   ;;  %s1709_s1 = inlined_call_operand.vmem [shape: f32[2,8], index: 1, kind: input, shape index: {}]   ;;  %s1710_s4 = inlined_call_operand.vmem [shape: f32[32,32], index: 4, kind: input, shape index: {}]   ;;  %s1711_s5 = inlined_call_operand.vmem [shape: f32[1,32], index: 5, kind: input, shape index: {}]   ;;  %s1712_s8 = inlined_call_operand.vmem [shape: f32[32,64], index: 8, kind: input, shape index: {}]   ;;  %s1713_s6 = inlined_call_operand.vmem [shape: f32[1,32], index: 6, kind: input, shape index: {}]   ;;  %s1714_s7 = inlined_call_operand.vmem [shape: f32[1,32], index: 7, kind: input, shape index: {}]   ;;  %s1715_s10 = inlined_call_operand.vmem [shape: f32[64,32], index: 10, kind: input, shape index: {}]   ;;  %s1716_s9 = inlined_call_operand.vmem [shape: f32[1,64], index: 9, kind: input, shape index: {}]   ;;  %s1717_s11 = inlined_call_operand.vmem [shape: f32[1,32], index: 11, kind: input, shape index: {}]   ;;  %s1718_s12 = inlined_call_operand.vmem [shape: f32[1,32], index: 12, kind: input, shape index: {}]   ;;  %s1719_s13 = inlined_call_operand.vmem [shape: f32[1,32], index: 13, kind: input, shape index: {}]   ;;  %s1720_s14 = inlined_call_operand.vmem [shape: f32[16,32], index: 14, kind: output, shape index: {}]  }
   0x1   :  { %v52_v0 = vld [vmem:[%s1706_s2 + $0x18] sm:$0xff]  ;;  %v51_v1 = vld [vmem:[%s1706_s2 + $0x10] sm:$0xff]  ;;  %v1524_v2 = vld [vmem:[%s1707_s0] sm:$0xff]  ;;  %1325 = vmatprep.subr.mxu0 %v1432_v6  ;;  %1327 = vmatprep.mubr.msk.f32.mxu0 %vm1433_vm1, %v1432_v6  ;;  %s1436_s27 = smov 80   ;;  %v222_v18 = vlaneseq  ;;  %vm227_vm3 = vcmask 64512   ;;  %s1438_s29 = smov 48  }
   0x2   :  { %1304 = vmatprep.subr.mxu1 %v52_v0  ;;  %v50_v3 = vld [vmem:[%s1706_s2 + $0x8] sm:$0xff]  ;;  %1312 = vmatprep.mubr.msk.f32.mxu1 %vm60_vm0, %v1524_v2  ;;  %v49_v4 = vld [vmem:[%s1706_s2] sm:$0xff]  ;;  %s1439_s22 = smov 16   ;;  %vm487_vm4 = vcmask 261248   ;;  %vm1098_vm5 = vcmask 523264  }
   0x3   :  { %1305 = vmatpush3.msra.mxu1 %v52_v0  ;;  %v1537_v5 = vld [vmem:[%s1707_s0 + $0x8] sm:$0xff]  ;;  %v1232_v8 = vld [vmem:[%s1708_s3] ss:$0 sm:$0xff]  ;;  %v223_v19 = vshrl.u32 %v222_v18, 7 }
   0x4   :  { %1306 = vmatprep.subr.mxu1 %v51_v1  ;;  %v142_v21 = vld [vmem:[%s1709_s1] sm:$0x3]  ;;  %s1437_s1 = smov 64  }
   0x5   :  { %1307 = vmatpush3.msra.mxu1 %v51_v1  ;;  %v224_v20 = vsub.s32 0, %v223_v19  ;;  %v569_v27 = vsub.s32 1, %v223_v19 }
   0x6   :  { %1308 = vmatprep.subr.mxu1 %v50_v3 }
   0x7   :  { %1309 = vmatpush3.msra.mxu1 %v50_v3  ;;  %v225_v22 = vrot.slane %v142_v21, %v224_v20  ;;  %v570_v33 = vrot.slane %v142_v21, %v569_v27  ;;  %v837_v21 = vld [vmem:[%s1710_s4 + $0x18] sm:$0xff] }
   0x8   :  { %1310 = vmatprep.subr.mxu1 %v49_v4 }
   0x9   :  { %1311 = vmatpush3.msra.mxu1 %v49_v4 }
   0xa   :  { %1313 = vmatmul.mubr.msk.f32.vlgmr.msra.gmra.mxu1 %vm60_vm0, %v1537_v5  ;;  %1315 = vmatprep.subr.mxu1 %v1432_v6 }
   0xb   :  { %1317 = vmatprep.mubr.msk.f32.mxu1 %vm1433_vm1, %v1432_v6 }
  0xca   :  { %v1314_v7 = vpop.f32.mrf.mxu1 }
  0xcb   :  { %v1554_v11 = vadd.f32 %v1314_v7, %v1232_v8 }
  0xcc   :  { %v133_v9 = vpop.f32.mrf.mxu1 }
  0xcd   :  { %v1550_v10 = vadd.f32 %v1232_v8, %v133_v9 }
  0xcf   :  { %316 = vrot.lane.b32.xlu1 %v1550_v10, %s1434_s25  ;;  %144 = vrot.lane.b32.xlu0 %v1550_v10, %s1435_s26 }
  0xd3   :  { %490 = vrot.lane.b32.xlu1 %v1554_v11, %s1435_s26  ;;  %318 = vrot.lane.b32.xlu0 %v1550_v10, %s1436_s27 }
  0xd7   :  { %660 = vrot.lane.b32.xlu1 %v1554_v11, %s1434_s25  ;;  %662 = vrot.lane.b32.xlu0 %v1554_v11, %s1436_s27 }
 0x141   :  { %v145_v12 = vpop.permute.xlu0 %144  ;;  %v317_v13 = vpop.permute.xlu1 %316 }
 0x142   :  { %1316 = vmatpush3.xpose.msk.msra.mxu1 %vm146_vm2, %v145_v12 }
 0x143   :  { %1320 = vmatprep.subr.mxu1 %v1432_v6 }
 0x145   :  { %1318 = vmatmul.mubr.msk.f32.vlgmr.msra.gmra.mxu1 %vm146_vm2, %v1550_v10  ;;  %v319_v14 = vpop.permute.xlu0 %318  ;;  %v491_v15 = vpop.permute.xlu1 %490 }
 0x146   :  { %1326 = vmatpush3.xpose.msk.msra.mxu0 %vm146_vm2, %v319_v14  ;;  %1322 = vmatprep.mubr.msk.f32.mxu1 %vm1433_vm1, %v1432_v6 }
 0x147   :  { %1335 = vmatprep.subr.mxu0 %v1432_v6 }
 0x149   :  { %1328 = vmatmul.mubr.msk.f32.vlgmr.msra.gmra.mxu0 %vm146_vm2, %v317_v13  ;;  %v663_v16 = vpop.permute.xlu0 %662  ;;  %v661_v17 = vpop.permute.xlu1 %660 }
 0x14a   :  { %1336 = vmatpush3.xpose.msk.msra.mxu0 %vm146_vm2, %v491_v15  ;;  %1337 = vmatprep.mubr.msk.f32.mxu0 %vm1433_vm1, %v1432_v6 }
 0x14b   :  { %1345 = vmatprep.subr.mxu0 %v1432_v6 }
 0x14d   :  { %1338 = vmatmul.mubr.msk.f32.vlgmr.msra.gmra.mxu0 %vm146_vm2, %v1554_v11 }
 0x14e   :  { %1346 = vmatpush3.xpose.msk.msra.mxu0 %vm146_vm2, %v663_v16  ;;  %1347 = vmatprep.mubr.msk.f32.mxu0 %vm1433_vm1, %v1432_v6 }
 0x14f   :  { %1355 = vmatprep.subr.mxu0 %v837_v21 }
 0x151   :  { %1348 = vmatmul.mubr.msk.f32.vlgmr.msra.gmra.mxu0 %vm146_vm2, %v661_v17 }
 0x152   :  { %1356 = vmatpush3.msra.mxu0 %v837_v21 }
 0x205   :  { %v217_v23 = vpop.f32.mrf.mxu1 }
 0x206   :  { %v221_v24 = vmul.f32 0.25, %v217_v23 }
 0x207   :  { %v1319_v25 = vpop.f32.mrf.mxu1 }
 0x208   :  { %v226_v26 = vadd.f32 %v225_v22, %v221_v24  ;;  %v834_v25 = vld [vmem:[%s1710_s4] sm:$0xff] }
 0x209   :  { %v390_v28 = vpop.f32.mrf.mxu0 }
 0x20a   :  { %v394_v29 = vmul.f32 0.25, %v390_v28  ;;  %v228_v30 = vsel %vm227_vm3, %v226_v26, -inf }
 0x20b   :  { %229 = vmax.xlane.f32.xlu0 %v228_v30  ;;  %v1329_v31 = vpop.f32.mrf.mxu0 }
 0x20c   :  { %v395_v32 = vadd.f32 %v394_v29, %v225_v22  ;;  %v836_v22 = vld [vmem:[%s1710_s4 + $0x10] sm:$0xff] }
 0x20d   :  { %v562_v34 = vpop.f32.mrf.mxu0  ;;  %1357 = vmatprep.subr.mxu0 %v836_v22 }
 0x20e   :  { %v566_v35 = vmul.f32 0.25, %v562_v34  ;;  %v396_v36 = vsel %vm227_vm3, %v395_v32, -inf  ;;  %1358 = vmatpush3.msra.mxu0 %v836_v22 }
 0x20f   :  { %397 = vmax.xlane.f32.xlu1 %v396_v36  ;;  %v1339_v37 = vpop.f32.mrf.mxu0 }
 0x210   :  { %v571_v38 = vadd.f32 %v570_v33, %v566_v35  ;;  %v1247_v35 = vld [vmem:[%s1711_s5] ss:$0 sm:$0xff] }
 0x211   :  { %v734_v39 = vpop.f32.mrf.mxu0 }
 0x212   :  { %v738_v40 = vmul.f32 0.25, %v734_v39  ;;  %v572_v41 = vsel %vm227_vm3, %v571_v38, -inf }
 0x213   :  { %573 = vmax.xlane.f32.xlu0 %v572_v41  ;;  %v1349_v42 = vpop.f32.mrf.mxu0 }
 0x214   :  { %v739_v43 = vadd.f32 %v738_v40, %v570_v33 }
 0x216   :  { %v740_v44 = vsel %vm227_vm3, %v739_v43, -inf }
 0x217   :  { %741 = vmax.xlane.f32.xlu0 %v740_v44 }
 0x220   :  { %239 = vrot.lane.b32.xlu1 %v1550_v10, %s1437_s1 }
 0x294   :  { %v230_v45 = vpop.xlane.xlu0 %229 }
 0x295   :  { %v231_v46 = vsub.f32 %v226_v26, %v230_v45 }
 0x297   :  { %v232_v47 = vmul.f32 1.442695, %v231_v46 }
 0x298   :  { %v398_v48 = vpop.xlane.xlu1 %397 }
 0x299   :  { %1404 = vpow2.f32 %v232_v47  ;;  %v399_v49 = vsub.f32 %v395_v32, %v398_v48 }
 0x29b   :  { %v400_v50 = vmul.f32 1.442695, %v399_v49 }
 0x29c   :  { %v240_v51 = vpop.permute.xlu1 %239  ;;  %v574_v52 = vpop.xlane.xlu0 %573 }
 0x29d   :  { %1406 = vpow2.f32 %v400_v50  ;;  %v575_v53 = vsub.f32 %v571_v38, %v574_v52  ;;  %1321 = vmatpush3.msra.mxu1 %v240_v51 }
 0x29e   :  { %1330 = vmatprep.subr.mxu1 %v1432_v6 }
 0x29f   :  { %v576_v54 = vmul.f32 1.442695, %v575_v53  ;;  %v975_v53 = vld [vmem:[%s1712_s8 + $0x10] sm:$0xff] }
 0x2a0   :  { %v742_v55 = vpop.xlane.xlu0 %741 }
 0x2a1   :  { %1408 = vpow2.f32 %v576_v54  ;;  %v743_v56 = vsub.f32 %v739_v43, %v742_v55  ;;  %v974_v54 = vld [vmem:[%s1712_s8 + $0x8] sm:$0xff]  ;;  %v973_v55 = vld [vmem:[%s1712_s8] sm:$0xff] }
 0x2a3   :  { %v744_v57 = vmul.f32 1.442695, %v743_v56 }
 0x2a5   :  { %1410 = vpow2.f32 %v744_v57 }
 0x2a6   :  { %v1405_v58 = vpop.eup %1404 }
 0x2a7   :  { %v234_v59 = vsel %vm227_vm3, %v1405_v58, 0.0 }
 0x2a8   :  { %235 = vadd.xlane.f32.xlu1 %v234_v59 }
 0x2aa   :  { %v1407_v60 = vpop.eup %1406 }
 0x2ab   :  { %v402_v61 = vsel %vm227_vm3, %v1407_v60, 0.0 }
 0x2ac   :  { %403 = vadd.xlane.f32.xlu0 %v402_v61 }
 0x2ae   :  { %v1409_v62 = vpop.eup %1408 }
 0x2af   :  { %v578_v63 = vsel %vm227_vm3, %v1409_v62, 0.0 }
 0x2b0   :  { %579 = vadd.xlane.f32.xlu1 %v578_v63  ;;  %v1250_v63 = vld [vmem:[%s1713_s6] ss:$0 sm:$0xff] }
 0x2b2   :  { %v1411_v0 = vpop.eup %1410 }
 0x2b3   :  { %v746_v1 = vsel %vm227_vm3, %v1411_v0, 0.0 }
 0x2b4   :  { %747 = vadd.xlane.f32.xlu0 %v746_v1  ;;  %v1251_v1 = vld [vmem:[%s1714_s7] ss:$0 sm:$0xff] }
 0x2c1   :  { %583 = vrot.lane.b32.xlu1 %v1554_v11, %s1437_s1 }
 0x2c5   :  { %751 = vrot.lane.b32.xlu1 %v1554_v11, %s1438_s29 }
 0x2ca   :  { %407 = vrot.lane.b32.xlu0 %v1550_v10, %s1438_s29 }
 0x331   :  { %v236_v3 = vpop.xlane.xlu1 %235 }
 0x332   :  { %1412 = vrcp.f32 %v236_v3 }
 0x335   :  { %v404_v4 = vpop.xlane.xlu0 %403 }
 0x336   :  { %1414 = vrcp.f32 %v404_v4 }
 0x339   :  { %v580_v7 = vpop.xlane.xlu1 %579 }
 0x33a   :  { %1416 = vrcp.f32 %v580_v7 }
 0x33d   :  { %v748_v8 = vpop.xlane.xlu0 %747  ;;  %v584_v11 = vpop.permute.xlu1 %583 }
 0x33e   :  { %1418 = vrcp.f32 %v748_v8 }
 0x33f   :  { %v1413_v9 = vpop.eup %1412 }
 0x340   :  { %v238_v12 = vmul.f32 %v1413_v9, %v1405_v58 }
 0x341   :  { %v408_v13 = vpop.permute.xlu0 %407  ;;  %v752_v17 = vpop.permute.xlu1 %751 }
 0x342   :  { %1323 = vmatmul.mubr.msk.f32.vlgmr.msra.gmra.mxu1 %vm227_vm3, %v238_v12 }
 0x343   :  { %v1415_v14 = vpop.eup %1414  ;;  %1331 = vmatpush3.msra.mxu1 %v408_v13  ;;  %1332 = vmatprep.mubr.msk.f32.mxu1 %vm1433_vm1, %v1432_v6  ;;  %v1090_v13 = vld [vmem:[%s1715_s10 + $0x38] sm:$0xff] }
 0x344   :  { %1340 = vmatprep.subr.mxu1 %v1432_v6  ;;  %v406_v10 = vmul.f32 %v1415_v14, %v1407_v60  ;;  %v1089_v14 = vld [vmem:[%s1715_s10 + $0x30] sm:$0xff] }
 0x346   :  { %1333 = vmatmul.mubr.msk.f32.vlgmr.msra.gmra.mxu1 %vm227_vm3, %v406_v10  ;;  %v1087_v10 = vld [vmem:[%s1715_s10 + $0x20] sm:$0xff] }
 0x347   :  { %v1417_v15 = vpop.eup %1416  ;;  %1341 = vmatpush3.msra.mxu1 %v584_v11  ;;  %1342 = vmatprep.mubr.msk.f32.mxu1 %vm1433_vm1, %v1432_v6  ;;  %v1088_v11 = vld [vmem:[%s1715_s10 + $0x28] sm:$0xff] }
 0x348   :  { %1350 = vmatprep.subr.mxu1 %v1432_v6  ;;  %v582_v16 = vmul.f32 %v1417_v15, %v1409_v62  ;;  %v1086_v15 = vld [vmem:[%s1715_s10 + $0x18] sm:$0xff] }
 0x34a   :  { %1343 = vmatmul.mubr.msk.f32.vlgmr.msra.gmra.mxu1 %vm227_vm3, %v582_v16  ;;  %v1085_v16 = vld [vmem:[%s1715_s10 + $0x10] sm:$0xff] }
 0x34b   :  { %v1419_v18 = vpop.eup %1418  ;;  %1351 = vmatpush3.msra.mxu1 %v752_v17  ;;  %1352 = vmatprep.mubr.msk.f32.mxu1 %vm1433_vm1, %v1432_v6  ;;  %v835_v6 = vld [vmem:[%s1710_s4 + $0x8] sm:$0xff] }
 0x34c   :  { %v750_v19 = vmul.f32 %v1419_v18, %v1411_v0  ;;  %1359 = vmatprep.subr.mxu0 %v835_v6  ;;  %v1084_v17 = vld [vmem:[%s1715_s10 + $0x8] sm:$0xff]  ;;  %v1083_v18 = vld [vmem:[%s1715_s10] sm:$0xff] }
 0x34d   :  { %1360 = vmatpush3.msra.mxu0 %v835_v6 }
 0x34e   :  { %1353 = vmatmul.mubr.msk.f32.vlgmr.msra.gmra.mxu1 %vm227_vm3, %v750_v19  ;;  %1361 = vmatprep.subr.mxu0 %v834_v25  ;;  %v1252_v19 = vld [vmem:[%s1716_s9] ss:$0 sm:$0xff] }
 0x34f   :  { %1362 = vmatpush3.msra.mxu0 %v834_v25 }
 0x350   :  { %1377 = vmatprep.subr.mxu0 %v1090_v13 }
 0x402   :  { %v311_v20 = vpop.f32.mrf.mxu1 }
 0x403   :  { %315 = vst.msk [vmem:[#allocation2] sm:$0xff] %vm146_vm2, %v311_v20 }
 0x404   :  { %v1324_v23 = vpop.f32.mrf.mxu1 }
 0x406   :  { %v479_v24 = vpop.f32.mrf.mxu1 }
 0x407   :  { %484 = vrot.lane.b32.xlu0 %v479_v24, %s1439_s22 }
 0x408   :  { %v1334_v26 = vpop.f32.mrf.mxu1 }
 0x40a   :  { %v655_v27 = vpop.f32.mrf.mxu1 }
 0x40b   :  { %659 = vst.msk [vmem:[#allocation2 + $0x8] sm:$0xff] %vm146_vm2, %v655_v27 }
 0x40c   :  { %v1344_v28 = vpop.f32.mrf.mxu1 }
 0x40e   :  { %v823_v29 = vpop.f32.mrf.mxu1 }
 0x40f   :  { %828 = vrot.lane.b32.xlu1 %v823_v29, %s1439_s22 }
 0x410   :  { %v1354_v30 = vpop.f32.mrf.mxu1 }
 0x479   :  { %v485_v31 = vpop.permute.xlu0 %484 }
 0x47a   :  { %488 = vst.msk [vmem:[#allocation2] sm:$0xff] %vm487_vm4, %v485_v31 }
 0x481   :  { %v829_v32 = vpop.permute.xlu1 %828  ;;  %v832_v33 = vld [vmem:[#allocation2] sm:$0xff] }
 0x482   :  { %831 = vst.msk [vmem:[#allocation2 + $0x8] sm:$0xff] %vm487_vm4, %v829_v32  ;;  %1363 = vmatprep.mubr.msk.f32.mxu0 %vm60_vm0, %v832_v33 }
 0x489   :  { %v833_v34 = vld [vmem:[#allocation2 + $0x8] sm:$0xff] }
 0x48a   :  { %1364 = vmatmul.mubr.msk.f32.vlgmr.msra.gmra.mxu0 %vm60_vm0, %v833_v34 }
 0x48b   :  { %1378 = vmatpush3.msra.mxu0 %v1090_v13 }
 0x48c   :  { %1379 = vmatprep.subr.mxu0 %v1089_v14 }
 0x48d   :  { %1380 = vmatpush3.msra.mxu0 %v1089_v14 }
 0x48e   :  { %1381 = vmatprep.subr.mxu0 %v1088_v11 }
 0x48f   :  { %1382 = vmatpush3.msra.mxu0 %v1088_v11 }
 0x490   :  { %1383 = vmatprep.subr.mxu0 %v1087_v10 }
 0x491   :  { %1384 = vmatpush3.msra.mxu0 %v1087_v10 }
 0x492   :  { %1385 = vmatprep.subr.mxu0 %v1086_v15 }
 0x493   :  { %1386 = vmatpush3.msra.mxu0 %v1086_v15 }
 0x494   :  { %1387 = vmatprep.subr.mxu0 %v1085_v16 }
 0x495   :  { %1388 = vmatpush3.msra.mxu0 %v1085_v16 }
 0x496   :  { %1389 = vmatprep.subr.mxu0 %v1084_v17 }
 0x497   :  { %1390 = vmatpush3.msra.mxu0 %v1084_v17 }
 0x498   :  { %1391 = vmatprep.subr.mxu0 %v1083_v18 }
 0x499   :  { %1392 = vmatpush3.msra.mxu0 %v1083_v18 }
 0x54a   :  { %v1365_v36 = vpop.f32.mrf.mxu0 }
 0x54b   :  { %v923_v37 = vadd.f32 %v1365_v36, %v1247_v35 }
 0x54c   :  { %v917_v38 = vpop.f32.mrf.mxu0 }
 0x54d   :  { %v918_v39 = vadd.f32 %v1247_v35, %v917_v38  ;;  %v927_v40 = vadd.f32 %v923_v37, %v1537_v5 }
 0x54f   :  { %v933_v41 = vsel %vm60_vm0, %v927_v40, 0.0  ;;  %v926_v42 = vadd.f32 %v918_v39, %v1524_v2  ;;  %v976_v2 = vld [vmem:[%s1712_s8 + $0x18] sm:$0xff] }
 0x550   :  { %934 = vadd.xlane.f32.xlu1 %v933_v41  ;;  %1366 = vmatprep.subr.mxu1 %v976_v2  ;;  %v1255_v41 = vld [vmem:[%s1717_s11] ss:$0 sm:$0xff] }
 0x551   :  { %v930_v43 = vsel %vm60_vm0, %v926_v42, 0.0  ;;  %1367 = vmatpush3.msra.mxu1 %v976_v2 }
 0x552   :  { %931 = vadd.xlane.f32.xlu0 %v930_v43  ;;  %1368 = vmatprep.subr.mxu1 %v975_v53 }
 0x553   :  { %1369 = vmatpush3.msra.mxu1 %v975_v53 }
 0x554   :  { %1370 = vmatprep.subr.mxu1 %v974_v54 }
 0x555   :  { %1371 = vmatpush3.msra.mxu1 %v974_v54 }
 0x556   :  { %1372 = vmatprep.subr.mxu1 %v973_v55 }
 0x557   :  { %1373 = vmatpush3.msra.mxu1 %v973_v55 }
 0x5d9   :  { %v935_v44 = vpop.xlane.xlu1 %934 }
 0x5da   :  { %v938_v45 = vmul.f32 0.03125, %v935_v44 }
 0x5db   :  { %v932_v46 = vpop.xlane.xlu0 %931 }
 0x5dc   :  { %v937_v47 = vmul.f32 0.03125, %v932_v46  ;;  %v940_v48 = vsub.f32 %v927_v40, %v938_v45 }
 0x5de   :  { %v939_v49 = vsub.f32 %v926_v42, %v937_v47  ;;  %v942_v52 = vmul.f32 %v940_v48, %v940_v48 }
 0x5e0   :  { %v941_v50 = vmul.f32 %v939_v49, %v939_v49  ;;  %v946_v5 = vsel %vm60_vm0, %v942_v52, 0.0 }
 0x5e2   :  { %v943_v51 = vsel %vm60_vm0, %v941_v50, 0.0 }
 0x5e3   :  { %944 = vadd.xlane.f32.xlu0 %v943_v51 }
 0x5e7   :  { %947 = vadd.xlane.f32.xlu0 %v946_v5 }
 0x66c   :  { %v945_v56 = vpop.xlane.xlu0 %944 }
 0x66d   :  { %v949_v57 = vmul.f32 0.03125, %v945_v56 }
 0x66f   :  { %v951_v58 = vadd.f32 1e-12, %v949_v57 }
 0x670   :  { %v948_v59 = vpop.xlane.xlu0 %947 }
 0x671   :  { %1420 = vrsqrt.f32 %v951_v58  ;;  %v950_v60 = vmul.f32 0.03125, %v948_v59 }
 0x673   :  { %v952_v61 = vadd.f32 1e-12, %v950_v60 }
 0x675   :  { %1422 = vrsqrt.f32 %v952_v61 }
 0x67e   :  { %v1421_v62 = vpop.eup %1420 }
 0x67f   :  { %v955_v0 = vmul.f32 %v1421_v62, %v939_v49 }
 0x681   :  { %v963_v3 = vmul.f32 %v1250_v63, %v955_v0 }
 0x682   :  { %v1423_v4 = vpop.eup %1422 }
 0x683   :  { %v956_v7 = vmul.f32 %v1423_v4, %v940_v48  ;;  %v1652_v8 = vadd.f32 %v1251_v1, %v963_v3 }
 0x685   :  { %v964_v9 = vmul.f32 %v1250_v63, %v956_v7  ;;  %1374 = vmatprep.mubr.msk.f32.mxu1 %vm60_vm0, %v1652_v8  ;;  %v1259_v7 = vld [vmem:[%s1719_s13] ss:$0 sm:$0xff] }
 0x687   :  { %v972_v12 = vadd.f32 %v1251_v1, %v964_v9  ;;  %v1258_v1 = vld [vmem:[%s1718_s12] ss:$0 sm:$0xff] }
 0x689   :  { %1375 = vmatmul.mubr.msk.f32.vlgmr.msra.gmra.mxu1 %vm60_vm0, %v972_v12 }
 0x749   :  { %v1376_v20 = vpop.f32.mrf.mxu1 }
 0x74a   :  { %v1062_v21 = vadd.f32 %v1376_v20, %v1252_v19 }
 0x74b   :  { %v1056_v22 = vpop.f32.mrf.mxu1 }
 0x74c   :  { %v1068_v23 = vmul.f32 0.044715, %v1062_v21  ;;  %v1057_v6 = vadd.f32 %v1252_v19, %v1056_v22  ;;  %v1066_v38 = vmul.f32 0.5, %v1062_v21 }
 0x74e   :  { %v1070_v24 = vmul.f32 %v1068_v23, %v1062_v21  ;;  %v1067_v25 = vmul.f32 0.044715, %v1057_v6  ;;  %v1065_v36 = vmul.f32 0.5, %v1057_v6 }
 0x750   :  { %v1072_v26 = vmul.f32 %v1070_v24, %v1062_v21  ;;  %v1069_v27 = vmul.f32 %v1067_v25, %v1057_v6 }
 0x752   :  { %v1074_v28 = vadd.f32 %v1072_v26, %v1062_v21  ;;  %v1071_v29 = vmul.f32 %v1069_v27, %v1057_v6 }
 0x754   :  { %v1076_v30 = vmul.f32 0.7978846, %v1074_v28  ;;  %v1073_v31 = vadd.f32 %v1071_v29, %v1057_v6 }
 0x756   :  { %1424 = vtanh.f32 %v1076_v30  ;;  %v1075_v32 = vmul.f32 0.7978846, %v1073_v31 }
 0x758   :  { %1426 = vtanh.f32 %v1075_v32 }
 0x763   :  { %v1425_v33 = vpop.eup %1424 }
 0x764   :  { %v1080_v35 = vadd.f32 1.0, %v1425_v33 }
 0x765   :  { %v1427_v34 = vpop.eup %1426 }
 0x766   :  { %v1079_v37 = vadd.f32 1.0, %v1427_v34  ;;  %v1082_v40 = vmul.f32 %v1080_v35, %v1066_v38 }
 0x768   :  { %v1081_v39 = vmul.f32 %v1079_v37, %v1065_v36 }
 0x76a   :  { %1393 = vmatprep.mubr.msk.f32.mxu0 %vm1098_vm5, %v1081_v39 }
 0x76b   :  { %1394 = vmatmul.mubr.msk.f32.vlgmr.msra.gmra.mxu0 %vm1098_vm5, %v1082_v40 }
 0x82b   :  { %v1395_v42 = vpop.f32.mrf.mxu0 }
 0x82c   :  { %v1177_v43 = vadd.f32 %v1395_v42, %v1255_v41 }
 0x82d   :  { %v1171_v44 = vpop.f32.mrf.mxu0 }
 0x82e   :  { %v1172_v45 = vadd.f32 %v1255_v41, %v1171_v44  ;;  %v1181_v46 = vadd.f32 %v1177_v43, %v972_v12 }
 0x830   :  { %v1187_v47 = vsel %vm60_vm0, %v1181_v46, 0.0  ;;  %v1180_v48 = vadd.f32 %v1172_v45, %v1652_v8 }
 0x831   :  { %1188 = vadd.xlane.f32.xlu0 %v1187_v47 }
 0x832   :  { %v1184_v49 = vsel %vm60_vm0, %v1180_v48, 0.0 }
 0x833   :  { %1185 = vadd.xlane.f32.xlu1 %v1184_v49 }
 0x8ba   :  { %v1189_v50 = vpop.xlane.xlu0 %1188 }
 0x8bb   :  { %v1191_v51 = vmul.f32 0.03125, %v1189_v50 }
 0x8bc   :  { %v1186_v52 = vpop.xlane.xlu1 %1185 }
 0x8bd   :  { %v1193_v5 = vsub.f32 %v1181_v46, %v1191_v51  ;;  %v1190_v2 = vmul.f32 0.03125, %v1186_v52 }
 0x8bf   :  { %v1192_v53 = vsub.f32 %v1180_v48, %v1190_v2  ;;  %v1195_v54 = vmul.f32 %v1193_v5, %v1193_v5 }
 0x8c1   :  { %v1199_v55 = vsel %vm60_vm0, %v1195_v54, 0.0  ;;  %v1194_v56 = vmul.f32 %v1192_v53, %v1192_v53 }
 0x8c2   :  { %1200 = vadd.xlane.f32.xlu0 %v1199_v55 }
 0x8c3   :  { %v1196_v57 = vsel %vm60_vm0, %v1194_v56, 0.0 }
 0x8c4   :  { %1197 = vadd.xlane.f32.xlu1 %v1196_v57 }
 0x94b   :  { %v1201_v58 = vpop.xlane.xlu0 %1200 }
 0x94c   :  { %v1203_v59 = vmul.f32 0.03125, %v1201_v58 }
 0x94d   :  { %v1198_v60 = vpop.xlane.xlu1 %1197 }
 0x94e   :  { %v1205_v61 = vadd.f32 1e-12, %v1203_v59  ;;  %v1202_v62 = vmul.f32 0.03125, %v1198_v60 }
 0x950   :  { %1428 = vrsqrt.f32 %v1205_v61  ;;  %v1204_v63 = vadd.f32 1e-12, %v1202_v62 }
 0x952   :  { %1430 = vrsqrt.f32 %v1204_v63 }
 0x95d   :  { %v1429_v0 = vpop.eup %1428 }
 0x95e   :  { %v1209_v3 = vmul.f32 %v1429_v0, %v1193_v5 }
 0x95f   :  { %v1431_v4 = vpop.eup %1430 }
 0x960   :  { %v1217_v8 = vmul.f32 %v1258_v1, %v1209_v3  ;;  %v1208_v9 = vmul.f32 %v1431_v4, %v1192_v53 }
 0x962   :  { %v1225_v12 = vadd.f32 %v1259_v7, %v1217_v8  ;;  %v1216_v13 = vmul.f32 %v1258_v1, %v1208_v9 }
 0x964   :  { %1227 = vst.msk [vmem:[%s1720_s14 + $0x8] sm:$0xff] %vm60_vm0, %v1225_v12  ;;  %v1224_v14 = vadd.f32 %v1259_v7, %v1216_v13 }
 0x966   :  { %1226 = vst.msk [vmem:[%s1720_s14] sm:$0xff] %vm60_vm0, %v1224_v14 }

// kernel: model_forward.5
= control target key start
LH: loop header
LB: loop body
LE: loop exit
PB: predicated region body
PF: predicated region fallthrough
CT: control target
= control target key end

     0   :  { %vm72_vm0 = vcmask 261120   ;;  %v1675_v6 = vmov 0.0   ;;  %vm1676_vm1 = vmmov 0   ;;  %s1678_s30 = smov 96   ;;  %vm158_vm2 = vcmask 130048   ;;  %s2001_s2 = inlined_call_operand.vmem [shape: f32[32,96], index: 2, kind: input, shape index: {}]   ;;  %s2002_s0 = inlined_call_operand.vmem [shape: f32[16,32], index: 0, kind: input, shape index: {}]   ;;  %s2003_s3 = inlined_call_operand.vmem [shape: f32[1,96], index: 3, kind: input, shape index: {}]   ;;  %s2004_s1 = inlined_call_operand.vmem [shape: f32[2,8], index: 1, kind: input, shape index: {}]   ;;  %s2005_s4 = inlined_call_operand.vmem [shape: f32[32,32], index: 4, kind: input, shape index: {}]   ;;  %s2006_s5 = inlined_call_operand.vmem [shape: f32[1,32], index: 5, kind: input, shape index: {}]   ;;  %s2007_s8 = inlined_call_operand.vmem [shape: f32[32,64], index: 8, kind: input, shape index: {}]   ;;  %s2008_s6 = inlined_call_operand.vmem [shape: f32[1,32], index: 6, kind: input, shape index: {}]   ;;  %s2009_s7 = inlined_call_operand.vmem [shape: f32[1,32], index: 7, kind: input, shape index: {}]   ;;  %s2010_s10 = inlined_call_operand.vmem [shape: f32[64,32], index: 10, kind: input, shape index: {}]   ;;  %s2011_s9 = inlined_call_operand.vmem [shape: f32[1,64], index: 9, kind: input, shape index: {}]   ;;  %s2012_s11 = inlined_call_operand.vmem [shape: f32[1,32], index: 11, kind: input, shape index: {}]   ;;  %s2013_s14 = inlined_call_operand.vmem [shape: f32[32,32], index: 14, kind: input, shape index: {}]   ;;  %s2014_s12 = inlined_call_operand.vmem [shape: f32[1,32], index: 12, kind: input, shape index: {}]   ;;  %s2015_s13 = inlined_call_operand.vmem [shape: f32[1,32], index: 13, kind: input, shape index: {}]   ;;  %s2016_s16 = inlined_call_operand.vmem [shape: f32[32,3], index: 16, kind: input, shape index: {}]   ;;  %s2017_s15 = inlined_call_operand.vmem [shape: f32[1,32], index: 15, kind: input, shape index: {}]   ;;  %s2018_s17 = inlined_call_operand.vmem [shape: f32[1,3], index: 17, kind: input, shape index: {}]   ;;  %s2019_s18 = inlined_call_operand.vmem [shape: f32[16,3], index: 18, kind: output, shape index: {}]  }
   0x1   :  { %2022 = sst [smem:[#allocation3_spill]] %s2001_s2  ;;  %1532 = vmatprep.subr.mxu1 %v1675_v6  ;;  %1534 = vmatprep.mubr.msk.f32.mxu1 %vm1676_vm1, %v1675_v6  ;;  %s1679_s2 = smov 80   ;;  %v234_v18 = vlaneseq  ;;  %v154_v21 = vld [vmem:[%s2004_s1] sm:$0x3]  ;;  %vm239_vm3 = vcmask 64512   ;;  %vm499_vm4 = vcmask 261248  }
   0x2   :  { %2023 = sst [smem:[#allocation4_spill]] %s2002_s0  ;;  %s1680_s1 = smov 64   ;;  %vm1110_vm5 = vcmask 523264   ;;  %vm1424_vm6 = vcmask 23552  }
   0x3   :  { %2024 = sst [smem:[#allocation5_spill]] %s2003_s3  ;;  %v235_v19 = vshrl.u32 %v234_v18, 7 }
   0x4   :  { %s2025_s29 = sld [smem:[#allocation3_spill]] }
   0x5   :  { %s2026_s20 = sld [smem:[#allocation4_spill]]  ;;  %v236_v20 = vsub.s32 0, %v235_v19  ;;  %v581_v27 = vsub.s32 1, %v235_v19 }
   0x6   :  { %s2027_s28 = sld [smem:[#allocation5_spill]] }
   0x7   :  { %v237_v22 = vrot.slane %v154_v21, %v236_v20  ;;  %v582_v33 = vrot.slane %v154_v21, %v581_v27  ;;  %v849_v21 = vld [vmem:[%s2005_s4 + $0x18] sm:$0xff] }
   0xa   :  { %v64_v0 = vld [vmem:[%s2025_s29 + $0x18] sm:$0xff]  ;;  %v63_v1 = vld [vmem:[%s2025_s29 + $0x10] sm:$0xff]  ;;  %v62_v3 = vld [vmem:[%s2025_s29 + $0x8] sm:$0xff] }
   0xb   :  { %1521 = vmatprep.subr.mxu0 %v64_v0  ;;  %v1787_v2 = vld [vmem:[%s2026_s20] sm:$0xff]  ;;  %v1800_v5 = vld [vmem:[%s2026_s20 + $0x8] sm:$0xff]  ;;  %s1681_s20 = smov 48  }
   0xc   :  { %1522 = vmatpush3.msra.mxu0 %v64_v0  ;;  %1529 = vmatprep.mubr.msk.f32.mxu0 %vm72_vm0, %v1787_v2  ;;  %v61_v4 = vld [vmem:[%s2025_s29] sm:$0xff]  ;;  %s1677_s29 = smov 112  }
   0xd   :  { %1523 = vmatprep.subr.mxu0 %v63_v1  ;;  %v1431_v8 = vld [vmem:[%s2027_s28] ss:$0 sm:$0xff]  ;;  %s1682_s28 = smov 16  }
   0xe   :  { %1524 = vmatpush3.msra.mxu0 %v63_v1 }
   0xf   :  { %1525 = vmatprep.subr.mxu0 %v62_v3 }
  0x10   :  { %1526 = vmatpush3.msra.mxu0 %v62_v3 }
  0x11   :  { %1527 = vmatprep.subr.mxu0 %v61_v4 }
  0x12   :  { %1528 = vmatpush3.msra.mxu0 %v61_v4 }
  0x13   :  { %1530 = vmatmul.mubr.msk.f32.vlgmr.msra.gmra.mxu0 %vm72_vm0, %v1800_v5  ;;  %1542 = vmatprep.subr.mxu0 %v1675_v6 }
  0x14   :  { %1544 = vmatprep.mubr.msk.f32.mxu0 %vm1676_vm1, %v1675_v6 }
  0xd3   :  { %v1531_v7 = vpop.f32.mrf.mxu0 }
  0xd4   :  { %v1817_v11 = vadd.f32 %v1531_v7, %v1431_v8 }
  0xd5   :  { %v145_v9 = vpop.f32.mrf.mxu0 }
  0xd6   :  { %v1813_v10 = vadd.f32 %v1431_v8, %v145_v9 }
  0xd8   :  { %328 = vrot.lane.b32.xlu1 %v1813_v10, %s1677_s29  ;;  %156 = vrot.lane.b32.xlu0 %v1813_v10, %s1678_s30 }
  0xdc   :  { %502 = vrot.lane.b32.xlu1 %v1817_v11, %s1678_s30  ;;  %330 = vrot.lane.b32.xlu0 %v1813_v10, %s1679_s2 }
  0xe0   :  { %672 = vrot.lane.b32.xlu1 %v1817_v11, %s1677_s29  ;;  %674 = vrot.lane.b32.xlu0 %v1817_v11, %s1679_s2 }
 0x14a   :  { %v157_v12 = vpop.permute.xlu0 %156  ;;  %v329_v13 = vpop.permute.xlu1 %328 }
 0x14b   :  { %1533 = vmatpush3.xpose.msk.msra.mxu1 %vm158_vm2, %v157_v12 }
 0x14c   :  { %1537 = vmatprep.subr.mxu1 %v1675_v6 }
 0x14e   :  { %1535 = vmatmul.mubr.msk.f32.vlgmr.msra.gmra.mxu1 %vm158_vm2, %v1813_v10  ;;  %v331_v14 = vpop.permute.xlu0 %330  ;;  %v503_v15 = vpop.permute.xlu1 %502 }
 0x14f   :  { %1543 = vmatpush3.xpose.msk.msra.mxu0 %vm158_vm2, %v331_v14  ;;  %1539 = vmatprep.mubr.msk.f32.mxu1 %vm1676_vm1, %v1675_v6 }
 0x150   :  { %1552 = vmatprep.subr.mxu0 %v1675_v6 }
 0x152   :  { %1545 = vmatmul.mubr.msk.f32.vlgmr.msra.gmra.mxu0 %vm158_vm2, %v329_v13  ;;  %v675_v16 = vpop.permute.xlu0 %674  ;;  %v673_v17 = vpop.permute.xlu1 %672 }
 0x153   :  { %1553 = vmatpush3.xpose.msk.msra.mxu0 %vm158_vm2, %v503_v15  ;;  %1554 = vmatprep.mubr.msk.f32.mxu0 %vm1676_vm1, %v1675_v6 }
 0x154   :  { %1562 = vmatprep.subr.mxu0 %v1675_v6 }
 0x156   :  { %1555 = vmatmul.mubr.msk.f32.vlgmr.msra.gmra.mxu0 %vm158_vm2, %v1817_v11 }
 0x157   :  { %1563 = vmatpush3.xpose.msk.msra.mxu0 %vm158_vm2, %v675_v16  ;;  %1564 = vmatprep.mubr.msk.f32.mxu0 %vm1676_vm1, %v1675_v6 }
 0x158   :  { %1572 = vmatprep.subr.mxu0 %v849_v21 }
 0x15a   :  { %1565 = vmatmul.mubr.msk.f32.vlgmr.msra.gmra.mxu0 %vm158_vm2, %v673_v17 }
 0x15b   :  { %1573 = vmatpush3.msra.mxu0 %v849_v21 }
 0x20e   :  { %v229_v23 = vpop.f32.mrf.mxu1 }
 0x20f   :  { %v233_v24 = vmul.f32 0.25, %v229_v23 }
 0x210   :  { %v1536_v25 = vpop.f32.mrf.mxu1 }
 0x211   :  { %v238_v26 = vadd.f32 %v237_v22, %v233_v24  ;;  %v846_v25 = vld [vmem:[%s2005_s4] sm:$0xff] }
 0x212   :  { %v402_v28 = vpop.f32.mrf.mxu0 }
 0x213   :  { %v406_v29 = vmul.f32 0.25, %v402_v28  ;;  %v240_v30 = vsel %vm239_vm3, %v238_v26, -inf }
 0x214   :  { %241 = vmax.xlane.f32.xlu0 %v240_v30  ;;  %v1546_v31 = vpop.f32.mrf.mxu0 }
 0x215   :  { %v407_v32 = vadd.f32 %v406_v29, %v237_v22  ;;  %v848_v22 = vld [vmem:[%s2005_s4 + $0x10] sm:$0xff] }
 0x216   :  { %v574_v34 = vpop.f32.mrf.mxu0  ;;  %1574 = vmatprep.subr.mxu0 %v848_v22 }
 0x217   :  { %v578_v35 = vmul.f32 0.25, %v574_v34  ;;  %v408_v36 = vsel %vm239_vm3, %v407_v32, -inf  ;;  %1575 = vmatpush3.msra.mxu0 %v848_v22 }
 0x218   :  { %409 = vmax.xlane.f32.xlu1 %v408_v36  ;;  %v1556_v37 = vpop.f32.mrf.mxu0 }
 0x219   :  { %v583_v38 = vadd.f32 %v582_v33, %v578_v35  ;;  %v1446_v35 = vld [vmem:[%s2006_s5] ss:$0 sm:$0xff] }
 0x21a   :  { %v746_v39 = vpop.f32.mrf.mxu0 }
 0x21b   :  { %v750_v40 = vmul.f32 0.25, %v746_v39  ;;  %v584_v41 = vsel %vm239_vm3, %v583_v38, -inf }
 0x21c   :  { %585 = vmax.xlane.f32.xlu0 %v584_v41  ;;  %v1566_v42 = vpop.f32.mrf.mxu0 }
 0x21d   :  { %v751_v43 = vadd.f32 %v750_v40, %v582_v33 }
 0x21f   :  { %v752_v44 = vsel %vm239_vm3, %v751_v43, -inf }
 0x220   :  { %753 = vmax.xlane.f32.xlu0 %v752_v44 }
 0x229   :  { %251 = vrot.lane.b32.xlu1 %v1813_v10, %s1680_s1 }
 0x29d   :  { %v242_v45 = vpop.xlane.xlu0 %241 }
 0x29e   :  { %v243_v46 = vsub.f32 %v238_v26, %v242_v45 }
 0x2a0   :  { %v244_v47 = vmul.f32 1.442695, %v243_v46 }
 0x2a1   :  { %v410_v48 = vpop.xlane.xlu1 %409 }
 0x2a2   :  { %1643 = vpow2.f32 %v244_v47  ;;  %v411_v49 = vsub.f32 %v407_v32, %v410_v48 }
 0x2a4   :  { %v412_v50 = vmul.f32 1.442695, %v411_v49 }
 0x2a5   :  { %v252_v51 = vpop.permute.xlu1 %251  ;;  %v586_v52 = vpop.xlane.xlu0 %585 }
 0x2a6   :  { %1645 = vpow2.f32 %v412_v50  ;;  %v587_v53 = vsub.f32 %v583_v38, %v586_v52  ;;  %1538 = vmatpush3.msra.mxu1 %v252_v51 }
 0x2a7   :  { %1547 = vmatprep.subr.mxu1 %v1675_v6 }
 0x2a8   :  { %v588_v54 = vmul.f32 1.442695, %v587_v53  ;;  %v987_v53 = vld [vmem:[%s2007_s8 + $0x10] sm:$0xff] }
 0x2a9   :  { %v754_v55 = vpop.xlane.xlu0 %753 }
 0x2aa   :  { %1647 = vpow2.f32 %v588_v54  ;;  %v755_v56 = vsub.f32 %v751_v43, %v754_v55  ;;  %v986_v54 = vld [vmem:[%s2007_s8 + $0x8] sm:$0xff]  ;;  %v985_v55 = vld [vmem:[%s2007_s8] sm:$0xff] }
 0x2ac   :  { %v756_v57 = vmul.f32 1.442695, %v755_v56 }
 0x2ae   :  { %1649 = vpow2.f32 %v756_v57 }
 0x2af   :  { %v1644_v58 = vpop.eup %1643 }
 0x2b0   :  { %v246_v59 = vsel %vm239_vm3, %v1644_v58, 0.0 }
 0x2b1   :  { %247 = vadd.xlane.f32.xlu1 %v246_v59 }
 0x2b3   :  { %v1646_v60 = vpop.eup %1645 }
 0x2b4   :  { %v414_v61 = vsel %vm239_vm3, %v1646_v60, 0.0 }
 0x2b5   :  { %415 = vadd.xlane.f32.xlu0 %v414_v61 }
 0x2b7   :  { %v1648_v62 = vpop.eup %1647 }
 0x2b8   :  { %v590_v63 = vsel %vm239_vm3, %v1648_v62, 0.0 }
 0x2b9   :  { %591 = vadd.xlane.f32.xlu1 %v590_v63  ;;  %v1449_v63 = vld [vmem:[%s2008_s6] ss:$0 sm:$0xff] }
 0x2bb   :  { %v1650_v0 = vpop.eup %1649 }
 0x2bc   :  { %v758_v1 = vsel %vm239_vm3, %v1650_v0, 0.0 }
 0x2bd   :  { %759 = vadd.xlane.f32.xlu0 %v758_v1  ;;  %v1450_v1 = vld [vmem:[%s2009_s7] ss:$0 sm:$0xff] }
 0x2ca   :  { %595 = vrot.lane.b32.xlu1 %v1817_v11, %s1680_s1 }
 0x2ce   :  { %763 = vrot.lane.b32.xlu1 %v1817_v11, %s1681_s20 }
 0x2d3   :  { %419 = vrot.lane.b32.xlu0 %v1813_v10, %s1681_s20 }
 0x33a   :  { %v248_v3 = vpop.xlane.xlu1 %247 }
 0x33b   :  { %1651 = vrcp.f32 %v248_v3 }
 0x33e   :  { %v416_v4 = vpop.xlane.xlu0 %415 }
 0x33f   :  { %1653 = vrcp.f32 %v416_v4 }
 0x342   :  { %v592_v7 = vpop.xlane.xlu1 %591 }
 0x343   :  { %1655 = vrcp.f32 %v592_v7 }
 0x346   :  { %v760_v8 = vpop.xlane.xlu0 %759  ;;  %v596_v11 = vpop.permute.xlu1 %595 }
 0x347   :  { %1657 = vrcp.f32 %v760_v8 }
 0x348   :  { %v1652_v9 = vpop.eup %1651 }
 0x349   :  { %v250_v12 = vmul.f32 %v1652_v9, %v1644_v58 }
 0x34a   :  { %v420_v13 = vpop.permute.xlu0 %419  ;;  %v764_v17 = vpop.permute.xlu1 %763 }
 0x34b   :  { %1540 = vmatmul.mubr.msk.f32.vlgmr.msra.gmra.mxu1 %vm239_vm3, %v250_v12 }
 0x34c   :  { %v1654_v14 = vpop.eup %1653  ;;  %1548 = vmatpush3.msra.mxu1 %v420_v13  ;;  %1549 = vmatprep.mubr.msk.f32.mxu1 %vm1676_vm1, %v1675_v6  ;;  %v1102_v13 = vld [vmem:[%s2010_s10 + $0x38] sm:$0xff] }
 0x34d   :  { %1557 = vmatprep.subr.mxu1 %v1675_v6  ;;  %v418_v10 = vmul.f32 %v1654_v14, %v1646_v60  ;;  %v1101_v14 = vld [vmem:[%s2010_s10 + $0x30] sm:$0xff] }
 0x34f   :  { %1550 = vmatmul.mubr.msk.f32.vlgmr.msra.gmra.mxu1 %vm239_vm3, %v418_v10  ;;  %v1099_v10 = vld [vmem:[%s2010_s10 + $0x20] sm:$0xff] }
 0x350   :  { %v1656_v15 = vpop.eup %1655  ;;  %1558 = vmatpush3.msra.mxu1 %v596_v11  ;;  %1559 = vmatprep.mubr.msk.f32.mxu1 %vm1676_vm1, %v1675_v6  ;;  %v1100_v11 = vld [vmem:[%s2010_s10 + $0x28] sm:$0xff] }
 0x351   :  { %1567 = vmatprep.subr.mxu1 %v1675_v6  ;;  %v594_v16 = vmul.f32 %v1656_v15, %v1648_v62  ;;  %v1098_v15 = vld [vmem:[%s2010_s10 + $0x18] sm:$0xff] }
 0x353   :  { %1560 = vmatmul.mubr.msk.f32.vlgmr.msra.gmra.mxu1 %vm239_vm3, %v594_v16  ;;  %v1097_v16 = vld [vmem:[%s2010_s10 + $0x10] sm:$0xff] }
 0x354   :  { %v1658_v18 = vpop.eup %1657  ;;  %1568 = vmatpush3.msra.mxu1 %v764_v17  ;;  %1569 = vmatprep.mubr.msk.f32.mxu1 %vm1676_vm1, %v1675_v6  ;;  %v847_v6 = vld [vmem:[%s2005_s4 + $0x8] sm:$0xff] }
 0x355   :  { %v762_v19 = vmul.f32 %v1658_v18, %v1650_v0  ;;  %1576 = vmatprep.subr.mxu0 %v847_v6  ;;  %v1096_v17 = vld [vmem:[%s2010_s10 + $0x8] sm:$0xff]  ;;  %v1095_v18 = vld [vmem:[%s2010_s10] sm:$0xff] }
 0x356   :  { %1577 = vmatpush3.msra.mxu0 %v847_v6 }
 0x357   :  { %1570 = vmatmul.mubr.msk.f32.vlgmr.msra.gmra.mxu1 %vm239_vm3, %v762_v19  ;;  %1578 = vmatprep.subr.mxu0 %v846_v25  ;;  %v1451_v19 = vld [vmem:[%s2011_s9] ss:$0 sm:$0xff] }
 0x358   :  { %1579 = vmatpush3.msra.mxu0 %v846_v25 }
 0x359   :  { %1594 = vmatprep.subr.mxu0 %v1102_v13 }
 0x40b   :  { %v323_v20 = vpop.f32.mrf.mxu1 }
 0x40c   :  { %327 = vst.msk [vmem:[#allocation2] sm:$0xff] %vm158_vm2, %v323_v20 }
 0x40d   :  { %v1541_v23 = vpop.f32.mrf.mxu1 }
 0x40f   :  { %v491_v24 = vpop.f32.mrf.mxu1 }
 0x410   :  { %496 = vrot.lane.b32.xlu0 %v491_v24, %s1682_s28 }
 0x411   :  { %v1551_v26 = vpop.f32.mrf.mxu1 }
 0x413   :  { %v667_v27 = vpop.f32.mrf.mxu1 }
 0x414   :  { %671 = vst.msk [vmem:[#allocation2 + $0x8] sm:$0xff] %vm158_vm2, %v667_v27 }
 0x415   :  { %v1561_v28 = vpop.f32.mrf.mxu1 }
 0x417   :  { %v835_v29 = vpop.f32.mrf.mxu1 }
 0x418   :  { %840 = vrot.lane.b32.xlu1 %v835_v29, %s1682_s28 }
 0x419   :  { %v1571_v30 = vpop.f32.mrf.mxu1 }
 0x482   :  { %v497_v31 = vpop.permute.xlu0 %496 }
 0x483   :  { %500 = vst.msk [vmem:[#allocation2] sm:$0xff] %vm499_vm4, %v497_v31 }
 0x48a   :  { %v841_v32 = vpop.permute.xlu1 %840  ;;  %v844_v33 = vld [vmem:[#allocation2] sm:$0xff] }
 0x48b   :  { %843 = vst.msk [vmem:[#allocation2 + $0x8] sm:$0xff] %vm499_vm4, %v841_v32  ;;  %1580 = vmatprep.mubr.msk.f32.mxu0 %vm72_vm0, %v844_v33 }
 0x492   :  { %v845_v34 = vld [vmem:[#allocation2 + $0x8] sm:$0xff] }
 0x493   :  { %1581 = vmatmul.mubr.msk.f32.vlgmr.msra.gmra.mxu0 %vm72_vm0, %v845_v34 }
 0x494   :  { %1595 = vmatpush3.msra.mxu0 %v1102_v13 }
 0x495   :  { %1596 = vmatprep.subr.mxu0 %v1101_v14 }
 0x496   :  { %1597 = vmatpush3.msra.mxu0 %v1101_v14 }
 0x497   :  { %1598 = vmatprep.subr.mxu0 %v1100_v11 }
 0x498   :  { %1599 = vmatpush3.msra.mxu0 %v1100_v11  ;;  %v1458_v11 = vld [vmem:[%s2015_s13] ss:$0 sm:$0xff] }
 0x499   :  { %1600 = vmatprep.subr.mxu0 %v1099_v10 }
 0x49a   :  { %1601 = vmatpush3.msra.mxu0 %v1099_v10 }
 0x49b   :  { %1602 = vmatprep.subr.mxu0 %v1098_v15 }
 0x49c   :  { %1603 = vmatpush3.msra.mxu0 %v1098_v15 }
 0x49d   :  { %1604 = vmatprep.subr.mxu0 %v1097_v16 }
 0x49e   :  { %1605 = vmatpush3.msra.mxu0 %v1097_v16 }
 0x49f   :  { %1606 = vmatprep.subr.mxu0 %v1096_v17 }
 0x4a0   :  { %1607 = vmatpush3.msra.mxu0 %v1096_v17  ;;  %v1335_v17 = vld [vmem:[%s2016_s16 + $0x18] sm:$0xff] }
 0x4a1   :  { %1608 = vmatprep.subr.mxu0 %v1095_v18 }
 0x4a2   :  { %1609 = vmatpush3.msra.mxu0 %v1095_v18  ;;  %v1334_v18 = vld [vmem:[%s2016_s16 + $0x10] sm:$0xff] }
 0x553   :  { %v1582_v36 = vpop.f32.mrf.mxu0 }
 0x554   :  { %v935_v37 = vadd.f32 %v1582_v36, %v1446_v35 }
 0x555   :  { %v929_v38 = vpop.f32.mrf.mxu0 }
 0x556   :  { %v930_v39 = vadd.f32 %v1446_v35, %v929_v38  ;;  %v939_v40 = vadd.f32 %v935_v37, %v1800_v5 }
 0x558   :  { %v945_v41 = vsel %vm72_vm0, %v939_v40, 0.0  ;;  %v938_v42 = vadd.f32 %v930_v39, %v1787_v2  ;;  %v988_v2 = vld [vmem:[%s2007_s8 + $0x18] sm:$0xff] }
 0x559   :  { %946 = vadd.xlane.f32.xlu1 %v945_v41  ;;  %1583 = vmatprep.subr.mxu1 %v988_v2  ;;  %v1454_v41 = vld [vmem:[%s2012_s11] ss:$0 sm:$0xff] }
 0x55a   :  { %v942_v43 = vsel %vm72_vm0, %v938_v42, 0.0  ;;  %1584 = vmatpush3.msra.mxu1 %v988_v2 }
 0x55b   :  { %943 = vadd.xlane.f32.xlu0 %v942_v43  ;;  %1585 = vmatprep.subr.mxu1 %v987_v53 }
 0x55c   :  { %1586 = vmatpush3.msra.mxu1 %v987_v53 }
 0x55d   :  { %1587 = vmatprep.subr.mxu1 %v986_v54 }
 0x55e   :  { %1588 = vmatpush3.msra.mxu1 %v986_v54 }
 0x55f   :  { %1589 = vmatprep.subr.mxu1 %v985_v55 }
 0x560   :  { %1590 = vmatpush3.msra.mxu1 %v985_v55 }
 0x5e2   :  { %v947_v44 = vpop.xlane.xlu1 %946 }
 0x5e3   :  { %v950_v45 = vmul.f32 0.03125, %v947_v44 }
 0x5e4   :  { %v944_v46 = vpop.xlane.xlu0 %943 }
 0x5e5   :  { %v949_v47 = vmul.f32 0.03125, %v944_v46  ;;  %v952_v48 = vsub.f32 %v939_v40, %v950_v45 }
 0x5e7   :  { %v951_v49 = vsub.f32 %v938_v42, %v949_v47  ;;  %v954_v52 = vmul.f32 %v952_v48, %v952_v48 }
 0x5e9   :  { %v953_v50 = vmul.f32 %v951_v49, %v951_v49  ;;  %v958_v5 = vsel %vm72_vm0, %v954_v52, 0.0 }
 0x5eb   :  { %v955_v51 = vsel %vm72_vm0, %v953_v50, 0.0 }
 0x5ec   :  { %956 = vadd.xlane.f32.xlu0 %v955_v51 }
 0x5f0   :  { %959 = vadd.xlane.f32.xlu0 %v958_v5 }
 0x675   :  { %v957_v56 = vpop.xlane.xlu0 %956 }
 0x676   :  { %v961_v57 = vmul.f32 0.03125, %v957_v56 }
 0x678   :  { %v963_v58 = vadd.f32 1e-12, %v961_v57 }
 0x679   :  { %v960_v59 = vpop.xlane.xlu0 %959 }
 0x67a   :  { %1659 = vrsqrt.f32 %v963_v58  ;;  %v962_v60 = vmul.f32 0.03125, %v960_v59  ;;  %v1241_v58 = vld [vmem:[%s2013_s14 + $0x18] sm:$0xff]  ;;  %v1240_v59 = vld [vmem:[%s2013_s14 + $0x10] sm:$0xff] }
 0x67b   :  { %1613 = vmatprep.subr.mxu1 %v1241_v58 }
 0x67c   :  { %v964_v61 = vadd.f32 1e-12, %v962_v60  ;;  %v1239_v60 = vld [vmem:[%s2013_s14 + $0x8] sm:$0xff] }
 0x67e   :  { %1661 = vrsqrt.f32 %v964_v61  ;;  %v1238_v61 = vld [vmem:[%s2013_s14] sm:$0xff] }
 0x687   :  { %v1660_v62 = vpop.eup %1659 }
 0x688   :  { %v967_v0 = vmul.f32 %v1660_v62, %v951_v49 }
 0x68a   :  { %v975_v3 = vmul.f32 %v1449_v63, %v967_v0 }
 0x68b   :  { %v1662_v4 = vpop.eup %1661 }
 0x68c   :  { %v968_v7 = vmul.f32 %v1662_v4, %v952_v48  ;;  %v1915_v8 = vadd.f32 %v1450_v1, %v975_v3 }
 0x68e   :  { %v976_v9 = vmul.f32 %v1449_v63, %v968_v7  ;;  %1591 = vmatprep.mubr.msk.f32.mxu1 %vm72_vm0, %v1915_v8 }
 0x690   :  { %v984_v12 = vadd.f32 %v1450_v1, %v976_v9 }
 0x692   :  { %1592 = vmatmul.mubr.msk.f32.vlgmr.msra.gmra.mxu1 %vm72_vm0, %v984_v12 }
 0x693   :  { %1614 = vmatpush3.msra.mxu1 %v1241_v58 }
 0x694   :  { %1615 = vmatprep.subr.mxu1 %v1240_v59 }
 0x695   :  { %1616 = vmatpush3.msra.mxu1 %v1240_v59 }
 0x696   :  { %1617 = vmatprep.subr.mxu1 %v1239_v60 }
 0x697   :  { %1618 = vmatpush3.msra.mxu1 %v1239_v60 }
 0x698   :  { %1619 = vmatprep.subr.mxu1 %v1238_v61 }
 0x699   :  { %1620 = vmatpush3.msra.mxu1 %v1238_v61 }
 0x69a   :  { %1624 = vmatprep.subr.mxu1 %v1335_v17 }
 0x752   :  { %v1593_v20 = vpop.f32.mrf.mxu1 }
 0x753   :  { %v1074_v21 = vadd.f32 %v1593_v20, %v1451_v19  ;;  %v1332_v20 = vld [vmem:[%s2016_s16] sm:$0xff] }
 0x754   :  { %v1068_v22 = vpop.f32.mrf.mxu1 }
 0x755   :  { %v1080_v23 = vmul.f32 0.044715, %v1074_v21  ;;  %v1069_v6 = vadd.f32 %v1451_v19, %v1068_v22  ;;  %v1078_v38 = vmul.f32 0.5, %v1074_v21  ;;  %v1333_v19 = vld [vmem:[%s2016_s16 + $0x8] sm:$0xff] }
 0x757   :  { %v1082_v24 = vmul.f32 %v1080_v23, %v1074_v21  ;;  %v1079_v25 = vmul.f32 0.044715, %v1069_v6  ;;  %v1077_v36 = vmul.f32 0.5, %v1069_v6 }
 0x759   :  { %v1084_v26 = vmul.f32 %v1082_v24, %v1074_v21  ;;  %v1081_v27 = vmul.f32 %v1079_v25, %v1069_v6 }
 0x75b   :  { %v1086_v28 = vadd.f32 %v1084_v26, %v1074_v21  ;;  %v1083_v29 = vmul.f32 %v1081_v27, %v1069_v6  ;;  %v1459_v21 = vld [vmem:[%s2017_s15] ss:$0 sm:$0xff] }
 0x75c   :  { %v1462_v27 = vld [vmem:[%s2018_s17] ss:$0 sm:$0xff] }
 0x75d   :  { %v1088_v30 = vmul.f32 0.7978846, %v1086_v28  ;;  %v1085_v31 = vadd.f32 %v1083_v29, %v1069_v6 }
 0x75f   :  { %1663 = vtanh.f32 %v1088_v30  ;;  %v1087_v32 = vmul.f32 0.7978846, %v1085_v31 }
 0x761   :  { %1665 = vtanh.f32 %v1087_v32 }
 0x76c   :  { %v1664_v33 = vpop.eup %1663 }
 0x76d   :  { %v1092_v35 = vadd.f32 1.0, %v1664_v33 }
 0x76e   :  { %v1666_v34 = vpop.eup %1665 }
 0x76f   :  { %v1091_v37 = vadd.f32 1.0, %v1666_v34  ;;  %v1094_v40 = vmul.f32 %v1092_v35, %v1078_v38 }
 0x771   :  { %v1093_v39 = vmul.f32 %v1091_v37, %v1077_v36 }
 0x773   :  { %1610 = vmatprep.mubr.msk.f32.mxu0 %vm1110_vm5, %v1093_v39 }
 0x774   :  { %1611 = vmatmul.mubr.msk.f32.vlgmr.msra.gmra.mxu0 %vm1110_vm5, %v1094_v40 }
 0x834   :  { %v1612_v42 = vpop.f32.mrf.mxu0 }
 0x835   :  { %v1189_v43 = vadd.f32 %v1612_v42, %v1454_v41 }
 0x836   :  { %v1183_v44 = vpop.f32.mrf.mxu0 }
 0x837   :  { %v1184_v45 = vadd.f32 %v1454_v41, %v1183_v44  ;;  %v1193_v46 = vadd.f32 %v1189_v43, %v984_v12 }
 0x839   :  { %v1199_v47 = vsel %vm72_vm0, %v1193_v46, 0.0  ;;  %v1192_v48 = vadd.f32 %v1184_v45, %v1915_v8  ;;  %v1457_v8 = vld [vmem:[%s2014_s12] ss:$0 sm:$0xff] }
 0x83a   :  { %1200 = vadd.xlane.f32.xlu0 %v1199_v47 }
 0x83b   :  { %v1196_v49 = vsel %vm72_vm0, %v1192_v48, 0.0 }
 0x83c   :  { %1197 = vadd.xlane.f32.xlu1 %v1196_v49 }
 0x8c3   :  { %v1201_v50 = vpop.xlane.xlu0 %1200 }
 0x8c4   :  { %v1203_v51 = vmul.f32 0.03125, %v1201_v50 }
 0x8c5   :  { %v1198_v52 = vpop.xlane.xlu1 %1197 }
 0x8c6   :  { %v1205_v5 = vsub.f32 %v1193_v46, %v1203_v51  ;;  %v1202_v2 = vmul.f32 0.03125, %v1198_v52 }
 0x8c8   :  { %v1204_v53 = vsub.f32 %v1192_v48, %v1202_v2  ;;  %v1207_v54 = vmul.f32 %v1205_v5, %v1205_v5 }
 0x8ca   :  { %v1211_v55 = vsel %vm72_vm0, %v1207_v54, 0.0  ;;  %v1206_v56 = vmul.f32 %v1204_v53, %v1204_v53 }
 0x8cb   :  { %1212 = vadd.xlane.f32.xlu0 %v1211_v55 }
 0x8cc   :  { %v1208_v57 = vsel %vm72_vm0, %v1206_v56, 0.0 }
 0x8cd   :  { %1209 = vadd.xlane.f32.xlu1 %v1208_v57 }
 0x954   :  { %v1213_v62 = vpop.xlane.xlu0 %1212 }
 0x955   :  { %v1215_v63 = vmul.f32 0.03125, %v1213_v62 }
 0x956   :  { %v1210_v0 = vpop.xlane.xlu1 %1209 }
 0x957   :  { %v1217_v1 = vadd.f32 1e-12, %v1215_v63  ;;  %v1214_v3 = vmul.f32 0.03125, %v1210_v0 }
 0x959   :  { %1667 = vrsqrt.f32 %v1217_v1  ;;  %v1216_v4 = vadd.f32 1e-12, %v1214_v3 }
 0x95b   :  { %1669 = vrsqrt.f32 %v1216_v4 }
 0x966   :  { %v1668_v7 = vpop.eup %1667 }
 0x967   :  { %v1221_v9 = vmul.f32 %v1668_v7, %v1205_v5 }
 0x968   :  { %v1670_v12 = vpop.eup %1669 }
 0x969   :  { %v1220_v13 = vmul.f32 %v1670_v12, %v1204_v53  ;;  %v1229_v14 = vmul.f32 %v1457_v8, %v1221_v9 }
 0x96b   :  { %v1228_v10 = vmul.f32 %v1457_v8, %v1220_v13  ;;  %v1237_v16 = vadd.f32 %v1458_v11, %v1229_v14 }
 0x96d   :  { %v1236_v15 = vadd.f32 %v1458_v11, %v1228_v10 }
 0x96f   :  { %1621 = vmatprep.mubr.msk.f32.mxu1 %vm72_vm0, %v1236_v15 }
 0x970   :  { %1622 = vmatmul.mubr.msk.f32.vlgmr.msra.gmra.mxu1 %vm72_vm0, %v1237_v16 }
 0x971   :  { %1625 = vmatpush3.msra.mxu1 %v1335_v17 }
 0x972   :  { %1626 = vmatprep.subr.mxu1 %v1334_v18 }
 0x973   :  { %1627 = vmatpush3.msra.mxu1 %v1334_v18 }
 0x974   :  { %1628 = vmatprep.subr.mxu1 %v1333_v19 }
 0x975   :  { %1629 = vmatpush3.msra.mxu1 %v1333_v19 }
 0x976   :  { %1630 = vmatprep.subr.mxu1 %v1332_v20 }
 0x977   :  { %1631 = vmatpush3.msra.mxu1 %v1332_v20 }
 0xa30   :  { %v1623_v22 = vpop.f32.mrf.mxu1 }
 0xa31   :  { %v1327_v23 = vadd.f32 %v1623_v22, %v1459_v21 }
 0xa32   :  { %v1321_v6 = vpop.f32.mrf.mxu1 }
 0xa33   :  { %v1322_v24 = vadd.f32 %v1459_v21, %v1321_v6 }
 0xa35   :  { %1671 = vtanh.f32 %v1322_v24 }
 0xa36   :  { %1673 = vtanh.f32 %v1327_v23 }
 0xa42   :  { %v1672_v25 = vpop.eup %1671 }
 0xa43   :  { %v1674_v26 = vpop.eup %1673  ;;  %1632 = vmatprep.mubr.msk.f32.mxu1 %vm72_vm0, %v1672_v25 }
 0xa44   :  { %1633 = vmatmul.mubr.msk.f32.vlgmr.msra.gmra.mxu1 %vm72_vm0, %v1674_v26 }
 0xb04   :  { %v1634_v28 = vpop.f32.mrf.mxu1 }
 0xb05   :  { %v1421_v29 = vadd.f32 %v1634_v28, %v1462_v27 }
 0xb06   :  { %v1415_v30 = vpop.f32.mrf.mxu1 }
 0xb07   :  { %1426 = vst.msk [vmem:[%s2019_s18 + $0x8] sm:$0xff] %vm1424_vm6, %v1421_v29  ;;  %v1416_v31 = vadd.f32 %v1462_v27, %v1415_v30 }
 0xb09   :  { %1425 = vst.msk [vmem:[%s2019_s18] sm:$0xff] %vm1424_vm6, %v1416_v31 }

</bundles_post_ra>
